<compile_context>
chip_gen: v7x
topology: tpu7x:2x2x1
jax: 0.10.0
libtpu: 0.0.40
codegen_flags: <defaults>
</compile_context>

<pallas_src>
import functools

import jax
import jax.numpy as jnp
from jax import lax
from jax.experimental import pallas as pl
from jax.experimental.pallas import tpu as pltpu

_NEG_INF = -1e30          # finite "minus infinity" (avoids inf-inf NaNs)
_CLS_PAD = 128            # classifier output padded to a full lane group
_VMEM_LIMIT = 32 * 1024 * 1024   # actual footprint is a few MiB; v7x VMEM is 64 MiB


def _tpu_is_v6_or_newer():
    try:
        kind = jax.devices()[0].device_kind.lower()
    except Exception:
        return False
    return ("v6" in kind) or ("v7" in kind) or ("tpu7" in kind)


# ----------------------------------------------------------------------------
# Kernel 1: per-node linear transforms (merged Wl|Wr, one MXU matmul) plus the
# per-node attention scalars 0.6*(att.xl) and 0.6*(att.xr).
# ----------------------------------------------------------------------------
def node_transform_kernel(x_ref, wlr_ref, blr_ref, att_ref,
                          xl_ref, xr_ref, al_ref, ar_ref):
    c = xl_ref.shape[1]
    x = x_ref[...].astype(jnp.bfloat16)
    xlr = jnp.dot(x, wlr_ref[...], preferred_element_type=jnp.float32) + blr_ref[...]
    xl = xlr[:, :c]
    xr = xlr[:, c:]
    att = att_ref[...]                                          # (1, c) f32
    al_ref[...] = 0.6 * jnp.sum(xl * att, axis=-1, keepdims=True)
    ar_ref[...] = 0.6 * jnp.sum(xr * att, axis=-1, keepdims=True)
    xl_ref[...] = xl.astype(xl_ref.dtype)   # bf16: RHS of the p@xl MXU matmul
    xr_ref[...] = xr                        # f32: 8-row-aligned dynamic slices


def node_transform(x, wlr, blr, att, *, block_m=128):
    n, f = x.shape
    c2 = wlr.shape[1]
    c = c2 // 2
    return pl.pallas_call(
        node_transform_kernel,
        out_shape=(jax.ShapeDtypeStruct((n, c), jnp.bfloat16),   # xl
                   jax.ShapeDtypeStruct((n, c), jnp.float32),    # xr
                   jax.ShapeDtypeStruct((n, 1), jnp.float32),    # 0.6*att.xl
                   jax.ShapeDtypeStruct((n, 1), jnp.float32)),   # 0.6*att.xr
        grid_spec=pltpu.PrefetchScalarGridSpec(
            num_scalar_prefetch=0,
            grid=(n // block_m,),
            in_specs=[pl.BlockSpec((block_m, f), lambda i: (i, 0)),
                      pl.BlockSpec((f, c2), lambda i: (0, 0)),
                      pl.BlockSpec((1, c2), lambda i: (0, 0)),
                      pl.BlockSpec((1, c), lambda i: (0, 0))],
            out_specs=(pl.BlockSpec((block_m, c), lambda i: (i, 0)),
                       pl.BlockSpec((block_m, c), lambda i: (i, 0)),
                       pl.BlockSpec((block_m, 1), lambda i: (i, 0)),
                       pl.BlockSpec((block_m, 1), lambda i: (i, 0)))),
        compiler_params=pltpu.CompilerParams(
            dimension_semantics=("parallel",),
            vmem_limit_bytes=_VMEM_LIMIT),
    )(x, wlr, blr, att)


# ----------------------------------------------------------------------------
# Kernel 2: flash-style tiled GATv2 attention with block sparsity (+ fused
#           ReLU, optional fused classifier projection on the last layer).
# ----------------------------------------------------------------------------
def gatv2_attn_kernel(occ_ref, xr_ref, xl_ref, ar_ref, al_ref, adj_ref,
                      att4_ref, bias_ref, *rest,
                      fuse_proj, c_chunk, row_sub, num_j, pw_dtype):
    if fuse_proj:
        pw_ref, pb_ref, out_ref, e_sc, m_sc, l_sc, acc_sc = rest
    else:
        out_ref, e_sc, m_sc, l_sc, acc_sc = rest

    i = pl.program_id(0)
    j = pl.program_id(1)

    @pl.when(j == 0)
    def _init():
        m_sc[...] = jnp.full_like(m_sc, _NEG_INF)
        l_sc[...] = jnp.zeros_like(l_sc)
        acc_sc[...] = jnp.zeros_like(acc_sc)

    # Block sparsity: skip source tiles that carry no edges into this target
    # tile (the scalar-prefetched occupancy table lives in SMEM).  Skipping is
    # exactly equivalent to processing an all-masked tile.
    @pl.when(occ_ref[i * num_j + j] > 0)
    def _update():
        ti = xr_ref.shape[0]
        tj = xl_ref.shape[0]
        c = xl_ref.shape[1]
        n_rsub = ti // row_sub
        n_csub = c // c_chunk

        # Pairwise term sum_c (0.4*att_c)*|xl[j]_c + xr[i]_c|, computed in
        # (row_sub, tj, c_chunk) slabs.  fori_loop (not a Python for) bounds
        # the live range of each slab so the VPU working set stays small and
        # independent of the DMA tile size.
        def row_body(r, carry):
            r0 = pl.multiple_of(r * row_sub, row_sub)

            def c_body(cb, e_acc):
                c0 = pl.multiple_of(cb * c_chunk, c_chunk)
                xr_c = xr_ref[pl.ds(r0, row_sub), pl.ds(c0, c_chunk)].astype(pw_dtype)
                xl_c = xl_ref[:, pl.ds(c0, c_chunk)].astype(pw_dtype)
                a_c = att4_ref[:, pl.ds(c0, c_chunk)].astype(pw_dtype)      # (1, cc)
                s = jnp.abs(xr_c[:, None, :] + xl_c[None, :, :])            # (rs, tj, cc)
                return e_acc + jnp.sum(s * a_c, axis=-1, dtype=jnp.float32)

            e_r = lax.fori_loop(0, n_csub, c_body,
                                jnp.zeros((row_sub, tj), jnp.float32))
            e_sc[pl.ds(r0, row_sub), :] = e_r
            return carry

        lax.fori_loop(0, n_rsub, row_body, 0)

        # e[i,j] = 0.6*(att.xr[i] + att.xl[j]) + pairwise  (exact leaky_relu algebra)
        adjf = adj_ref[...].astype(jnp.float32)                 # (ti, tj) 0/1
        e = e_sc[...] + ar_ref[...] + al_ref[...]
        e = jnp.where(adjf > 0.0, e, _NEG_INF)

        # Masked online softmax update.
        m_prev = m_sc[...]
        m_new = jnp.maximum(m_prev, jnp.max(e, axis=-1, keepdims=True))
        corr = jnp.exp(m_prev - m_new)
        # `* adjf` is kept: it zeroes fully-masked rows even while m is still
        # -inf (exp(0)=1 would otherwise leak in).
        p = jnp.exp(e - m_new) * adjf
        l_sc[...] = corr * l_sc[...] + jnp.sum(p, axis=-1, keepdims=True)
        acc_sc[...] = corr * acc_sc[...] + jnp.dot(
            p.astype(jnp.bfloat16), xl_ref[...],
            preferred_element_type=jnp.float32)
        m_sc[...] = m_new

    @pl.when(j == pl.num_programs(1) - 1)
    def _finalize():
        inv_l = pl.reciprocal(l_sc[...], approx=True)           # EUP, not VALU
        h = jnp.maximum(acc_sc[...] * inv_l + bias_ref[...], 0.0)
        if fuse_proj:
            out = jnp.dot(h.astype(jnp.bfloat16), pw_ref[...],
                          preferred_element_type=jnp.float32) + pb_ref[...]
            out_ref[...] = out.astype(out_ref.dtype)
        else:
            out_ref[...] = h.astype(out_ref.dtype)


def gatv2_attention(xl, xr, ar06, al06_row, adj, att04, bias, occ, *,
                    proj_w=None, proj_b=None, out_dtype=jnp.bfloat16,
                    block_i=128, block_j=128, c_chunk=128, row_sub=8,
                    pw_dtype=jnp.float32):
    n, c = xl.shape
    fuse = proj_w is not None
    c_out = proj_w.shape[1] if fuse else c
    num_i = n // block_i
    num_j = n // block_j
    c_chunk = min(c_chunk, c)

    in_specs = [
        pl.BlockSpec((block_i, c), lambda i, j, occ_r: (i, 0)),        # xr (targets, f32)
        pl.BlockSpec((block_j, c), lambda i, j, occ_r: (j, 0)),        # xl (sources, bf16)
        pl.BlockSpec((block_i, 1), lambda i, j, occ_r: (i, 0)),        # 0.6*att.xr
        pl.BlockSpec((1, block_j), lambda i, j, occ_r: (0, j)),        # 0.6*att.xl
        pl.BlockSpec((block_i, block_j), lambda i, j, occ_r: (i, j)),  # adj (int8)
        pl.BlockSpec((1, c), lambda i, j, occ_r: (0, 0)),              # 0.4*att
        pl.BlockSpec((1, c), lambda i, j, occ_r: (0, 0)),              # bias
    ]
    args = [xr, xl, ar06, al06_row, adj, att04, bias]
    if fuse:
        in_specs += [pl.BlockSpec((c, c_out), lambda i, j, occ_r: (0, 0)),
                     pl.BlockSpec((1, c_out), lambda i, j, occ_r: (0, 0))]
        args += [proj_w, proj_b]

    kernel = functools.partial(gatv2_attn_kernel, fuse_proj=fuse,
                               c_chunk=c_chunk, row_sub=row_sub,
                               num_j=num_j, pw_dtype=pw_dtype)
    return pl.pallas_call(
        kernel,
        out_shape=jax.ShapeDtypeStruct((n, c_out), out_dtype),
        grid_spec=pltpu.PrefetchScalarGridSpec(
            num_scalar_prefetch=1,
            grid=(num_i, num_j),
            in_specs=in_specs,
            out_specs=pl.BlockSpec((block_i, c_out), lambda i, j, occ_r: (i, 0)),
            scratch_shapes=[pltpu.VMEM((block_i, block_j), jnp.float32),  # e tile
                            pltpu.VMEM((block_i, 1), jnp.float32),        # running max
                            pltpu.VMEM((block_i, 1), jnp.float32),        # running sum
                            pltpu.VMEM((block_i, c), jnp.float32)]),      # accumulator
        compiler_params=pltpu.CompilerParams(
            dimension_semantics=("parallel", "arbitrary"),
            vmem_limit_bytes=_VMEM_LIMIT),
    )(occ, *args)


# ----------------------------------------------------------------------------
# Glue: dense int8 adjacency mask, block occupancy, padding.
# ----------------------------------------------------------------------------
def edge_index_to_adj(edge_index, n_pad):
    """adj[target, source] = 1 (int8), self-loops on every (incl. padded) row."""
    src, dst = edge_index[0], edge_index[1]
    adj = jnp.zeros((n_pad, n_pad), jnp.int8)
    adj = adj.at[dst, src].set(1)
    diag = jnp.arange(n_pad)
    adj = adj.at[diag, diag].set(1)
    return adj


def block_occupancy(adj, block_i, block_j):
    n = adj.shape[0]
    ni, nj = n // block_i, n // block_j
    occ = adj.astype(jnp.int32).reshape(ni, block_i, nj, block_j).sum(axis=(1, 3))
    return (occ > 0).astype(jnp.int32).reshape(-1)


def three_gat_cn_forward(x, edge_index, params, *, block_i=128, block_j=None,
                         block_m=128, c_chunk=128, row_sub=8,
                         pairwise_dtype=None):
    modern = _tpu_is_v6_or_newer()
    if block_j is None:
        block_j = 256 if modern else 128   # K of p@xl; v6e/v7x MXU depth is 256
    if pairwise_dtype is None:
        pairwise_dtype = jnp.bfloat16 if modern else jnp.float32  # v5e has no bf16 VPU

    n, f = x.shape
    blk = max(block_i, block_j, block_m)
    n_pad = ((max(n, blk) + blk - 1) // blk) * blk
    # TODO(synk): on v7x additionally pad n_pad to a multiple of 2*block_i so the
    # 'parallel' target axis always splits across both TensorCores on small graphs.

    x_pad = jnp.zeros((n_pad, f), x.dtype).at[:n].set(x)
    adj = edge_index_to_adj(edge_index, n_pad)
    occ = block_occupancy(adj, block_i, block_j)   # same grid for all layers

    h = x_pad
    n_layers = len(params["gat_layers"])
    for li, layer in enumerate(params["gat_layers"]):
        xl, xr, al06, ar06 = node_transform(h, layer["wlr"], layer["blr"],
                                            layer["att"], block_m=block_m)
        al06_row = al06.reshape(1, n_pad)          # contiguous reshape, no copy
        att04 = 0.4 * layer["att"]
        last = li == n_layers - 1
        h = gatv2_attention(
            xl, xr, ar06, al06_row, adj, att04, layer["bias"], occ,
            proj_w=params["cls_w"] if last else None,
            proj_b=params["cls_b"] if last else None,
            out_dtype=jnp.float32 if last else jnp.bfloat16,
            block_i=block_i, block_j=block_j, c_chunk=c_chunk,
            row_sub=row_sub, pw_dtype=pairwise_dtype)

    return h[:n, :params["num_classes"]]


# ----------------------------------------------------------------------------
# Deterministic parameter init (glorot-like), matching module shapes:
#   conv1: num_features -> 1024, conv2: 1024 -> 512, conv3: 512 -> 128,
#   classifier: 128 -> num_classes (padded to 128 lanes, sliced outside).
# Wl and Wr are stored merged as [Wl | Wr] for a single MXU matmul.
# ----------------------------------------------------------------------------
def init_params(key, num_features, num_classes):
    dims = [(num_features, 1024), (1024, 512), (512, 128)]
    layers = []
    for fin, fout in dims:
        key, k1, k2, k3 = jax.random.split(key, 4)
        scale = (2.0 / (fin + fout)) ** 0.5
        wl = jax.random.normal(k1, (fin, fout), jnp.float32) * scale
        wr = jax.random.normal(k2, (fin, fout), jnp.float32) * scale
        layers.append(dict(
            wlr=jnp.concatenate([wl, wr], axis=1).astype(jnp.bfloat16),
            blr=jnp.zeros((1, 2 * fout), jnp.float32),
            att=jax.random.normal(k3, (1, fout), jnp.float32)
                * (2.0 / (fout + 1)) ** 0.5,
            bias=jnp.zeros((1, fout), jnp.float32),
        ))
    key, kc = jax.random.split(key)
    cls_scale = (2.0 / (128 + num_classes)) ** 0.5
    cls_w = jax.random.normal(kc, (128, num_classes), jnp.float32) * cls_scale
    cls_w_pad = jnp.zeros((128, _CLS_PAD), jnp.float32).at[:, :num_classes].set(cls_w)
    return dict(
        gat_layers=layers,
        cls_w=cls_w_pad.astype(jnp.bfloat16),
        cls_b=jnp.zeros((1, _CLS_PAD), jnp.float32),
        num_classes=num_classes,
    )


# ----------------------------------------------------------------------------
# Pure-JAX f32 reference (dense GATv2) for a loose numeric cross-check.
# ----------------------------------------------------------------------------
def reference_forward(x, edge_index, params):
    n = x.shape[0]
    adj = jnp.zeros((n, n), jnp.float32).at[edge_index[1], edge_index[0]].set(1.0)
    adj = jnp.maximum(adj, jnp.eye(n, dtype=jnp.float32))
    h = x.astype(jnp.float32)
    for layer in params["gat_layers"]:
        wlr = layer["wlr"].astype(jnp.float32)
        c = wlr.shape[1] // 2
        xlr = h @ wlr + layer["blr"]
        xl, xr = xlr[:, :c], xlr[:, c:]
        att = layer["att"][0]
        s = xl[None, :, :] + xr[:, None, :]
        s = jnp.where(s > 0, s, 0.2 * s)
        e = jnp.einsum("ijc,c->ij", s, att)
        e = jnp.where(adj > 0, e, -jnp.inf)
        alpha = jax.nn.softmax(e, axis=-1)
        h = jnp.maximum(alpha @ xl + layer["bias"], 0.0)
    logits = h @ params["cls_w"].astype(jnp.float32) + params["cls_b"]
    return logits[:, :params["num_classes"]]


# ----------------------------------------------------------------------------
# Main
# ----------------------------------------------------------------------------
if __name__ == "__main__":
    num_features, num_classes, num_nodes = 8, 4, 16

    key = jax.random.PRNGKey(0)
    key, kx = jax.random.split(key)
    x = jax.random.normal(kx, (num_nodes, num_features), jnp.float32)

    # Deterministic small graph: bidirectional ring over the nodes.
    idx = jnp.arange(num_nodes, dtype=jnp.int32)
    nxt = (idx + 1) % num_nodes
    edge_index = jnp.stack([jnp.concatenate([idx, nxt]),
                            jnp.concatenate([nxt, idx])])       # [2, 2N]

    params = init_params(key, num_features, num_classes)

    logits = three_gat_cn_forward(x, edge_index, params)
    jax.block_until_ready(logits)
    assert logits.shape == (num_nodes, num_classes)
    assert bool(jnp.all(jnp.isfinite(logits)))

    # Loose cross-check vs. an f32 dense reference (bf16 storage + approx
    # reciprocal give ~1e-2 absolute drift at these magnitudes).
    ref = reference_forward(x, edge_index, params)
    err = float(jnp.max(jnp.abs(logits - ref)))
    assert err < 5e-2, f"kernel vs reference max|diff| = {err}"

    print("KERNEL_OK")
</pallas_src>

<mosaic_0001>
module attributes {stable_mosaic.version = 11 : i64} {
  func.func @node_transform_kernel(%arg0: i32, %arg1: memref<128x8xf32, #tpu.memory_space<vmem>>, %arg2: memref<8x2048xbf16, #tpu.memory_space<vmem>>, %arg3: memref<1x2048xf32, #tpu.memory_space<vmem>>, %arg4: memref<1x1024xf32, #tpu.memory_space<vmem>>, %arg5: memref<128x1024xbf16, #tpu.memory_space<vmem>>, %arg6: memref<128x1024xf32, #tpu.memory_space<vmem>>, %arg7: memref<128x1xf32, #tpu.memory_space<vmem>>, %arg8: memref<128x1xf32, #tpu.memory_space<vmem>>) attributes {dimension_semantics = [#tpu.dimension_semantics<parallel>], iteration_bounds = array<i64: 1>, scalar_prefetch = 0 : i64, scratch_operands = 0 : i64, tpu.core_type = #tpu.core_type<tc>, window_params = [{transform_indices = @transform_0, window_bounds = array<i64: 128, 8>}, {pipeline_mode = #tpu.pipeline_mode<synchronous>, transform_indices = @transform_1, window_bounds = array<i64: 8, 2048>}, {pipeline_mode = #tpu.pipeline_mode<synchronous>, transform_indices = @transform_2, window_bounds = array<i64: 1, 2048>}, {pipeline_mode = #tpu.pipeline_mode<synchronous>, transform_indices = @transform_3, window_bounds = array<i64: 1, 1024>}, {transform_indices = @transform_4, window_bounds = array<i64: 128, 1024>}, {transform_indices = @transform_5, window_bounds = array<i64: 128, 1024>}, {transform_indices = @transform_6, window_bounds = array<i64: 128, 1>}, {transform_indices = @transform_7, window_bounds = array<i64: 128, 1>}]} {
    %c0 = arith.constant 0 : index
    %c0_0 = arith.constant 0 : index
    %0 = vector.load %arg1[%c0, %c0_0] : memref<128x8xf32, #tpu.memory_space<vmem>>, vector<128x8xf32>
    %1 = arith.truncf %0 : vector<128x8xf32> to vector<128x8xbf16>
    %c0_1 = arith.constant 0 : index
    %c0_2 = arith.constant 0 : index
    %2 = vector.load %arg2[%c0_1, %c0_2] : memref<8x2048xbf16, #tpu.memory_space<vmem>>, vector<8x2048xbf16>
    %cst = arith.constant dense<0.000000e+00> : vector<128x2048xf32>
    %3 = tpu.matmul %1, %2, %cst {dimension_numbers = #tpu.dot_dimension_numbers<[1], [0], [0], [1], [0, 0, 1, 1], [], []>} : vector<128x8xbf16>, vector<8x2048xbf16>, vector<128x2048xf32> -> vector<128x2048xf32>
    %c0_3 = arith.constant 0 : index
    %c0_4 = arith.constant 0 : index
    %4 = vector.load %arg3[%c0_3, %c0_4] : memref<1x2048xf32, #tpu.memory_space<vmem>>, vector<1x2048xf32>
    %5 = vector.broadcast %4 : vector<1x2048xf32> to vector<128x2048xf32>
    %6 = arith.addf %3, %5 : vector<128x2048xf32>
    %7 = vector.extract_strided_slice %6 {offsets = [0, 0], sizes = [128, 1024], strides = [1, 1]} : vector<128x2048xf32> to vector<128x1024xf32>
    %8 = vector.extract_strided_slice %6 {offsets = [0, 1024], sizes = [128, 1024], strides = [1, 1]} : vector<128x2048xf32> to vector<128x1024xf32>
    %c0_5 = arith.constant 0 : index
    %c0_6 = arith.constant 0 : index
    %9 = vector.load %arg4[%c0_5, %c0_6] : memref<1x1024xf32, #tpu.memory_space<vmem>>, vector<1x1024xf32>
    %10 = vector.broadcast %9 : vector<1x1024xf32> to vector<128x1024xf32>
    %11 = arith.mulf %7, %10 : vector<128x1024xf32>
    %cst_7 = arith.constant dense<0.000000e+00> : vector<128xf32>
    %12 = vector.multi_reduction <add>, %11, %cst_7 [1] : vector<128x1024xf32> to vector<128xf32>
    %13 = vector.shape_cast %12 : vector<128xf32> to vector<128x1xf32>
    %cst_8 = arith.constant 6.000000e-01 : f32
    %14 = vector.broadcast %cst_8 : f32 to vector<128x1xf32>
    %15 = arith.mulf %14, %13 : vector<128x1xf32>
    %c0_9 = arith.constant 0 : index
    %c0_10 = arith.constant 0 : index
    %16 = vector.load %arg7[%c0_9, %c0_10] : memref<128x1xf32, #tpu.memory_space<vmem>>, vector<128x1xf32>
    tpu.vector_store %arg7[%c0_9, %c0_10], %15 {strides = array<i32>} : memref<128x1xf32, #tpu.memory_space<vmem>>, vector<128x1xf32>,
    %17 = vector.broadcast %9 : vector<1x1024xf32> to vector<128x1024xf32>
    %18 = arith.mulf %8, %17 : vector<128x1024xf32>
    %cst_11 = arith.constant dense<0.000000e+00> : vector<128xf32>
    %19 = vector.multi_reduction <add>, %18, %cst_11 [1] : vector<128x1024xf32> to vector<128xf32>
    %20 = vector.shape_cast %19 : vector<128xf32> to vector<128x1xf32>
    %cst_12 = arith.constant 6.000000e-01 : f32
    %21 = vector.broadcast %cst_12 : f32 to vector<128x1xf32>
    %22 = arith.mulf %21, %20 : vector<128x1xf32>
    %c0_13 = arith.constant 0 : index
    %c0_14 = arith.constant 0 : index
    %23 = vector.load %arg8[%c0_13, %c0_14] : memref<128x1xf32, #tpu.memory_space<vmem>>, vector<128x1xf32>
    tpu.vector_store %arg8[%c0_13, %c0_14], %22 {strides = array<i32>} : memref<128x1xf32, #tpu.memory_space<vmem>>, vector<128x1xf32>,
    %24 = arith.truncf %7 : vector<128x1024xf32> to vector<128x1024xbf16>
    %c0_15 = arith.constant 0 : index
    %c0_16 = arith.constant 0 : index
    %25 = vector.load %arg5[%c0_15, %c0_16] : memref<128x1024xbf16, #tpu.memory_space<vmem>>, vector<128x1024xbf16>
    tpu.vector_store %arg5[%c0_15, %c0_16], %24 {strides = array<i32>} : memref<128x1024xbf16, #tpu.memory_space<vmem>>, vector<128x1024xbf16>,
    %c0_17 = arith.constant 0 : index
    %c0_18 = arith.constant 0 : index
    %26 = vector.load %arg6[%c0_17, %c0_18] : memref<128x1024xf32, #tpu.memory_space<vmem>>, vector<128x1024xf32>
    tpu.vector_store %arg6[%c0_17, %c0_18], %8 {strides = array<i32>} : memref<128x1024xf32, #tpu.memory_space<vmem>>, vector<128x1024xf32>,
    return
  }
  func.func @transform_0(%arg0: i32) -> (i32, i32) {
    %c0_i32 = arith.constant 0 : i32
    %c0_i32_0 = arith.constant 0 : i32
    return %arg0, %c0_i32 : i32, i32
  }
  func.func @transform_1(%arg0: i32) -> (i32, i32) {
    %c0_i32 = arith.constant 0 : i32
    %c0_i32_0 = arith.constant 0 : i32
    %c0_i32_1 = arith.constant 0 : i32
    return %c0_i32, %c0_i32_0 : i32, i32
  }
  func.func @transform_2(%arg0: i32) -> (i32, i32) {
    %c0_i32 = arith.constant 0 : i32
    %c0_i32_0 = arith.constant 0 : i32
    %c0_i32_1 = arith.constant 0 : i32
    return %c0_i32, %c0_i32_0 : i32, i32
  }
  func.func @transform_3(%arg0: i32) -> (i32, i32) {
    %c0_i32 = arith.constant 0 : i32
    %c0_i32_0 = arith.constant 0 : i32
    %c0_i32_1 = arith.constant 0 : i32
    return %c0_i32, %c0_i32_0 : i32, i32
  }
  func.func @transform_4(%arg0: i32) -> (i32, i32) {
    %c0_i32 = arith.constant 0 : i32
    %c0_i32_0 = arith.constant 0 : i32
    return %arg0, %c0_i32 : i32, i32
  }
  func.func @transform_5(%arg0: i32) -> (i32, i32) {
    %c0_i32 = arith.constant 0 : i32
    %c0_i32_0 = arith.constant 0 : i32
    return %arg0, %c0_i32 : i32, i32
  }
  func.func @transform_6(%arg0: i32) -> (i32, i32) {
    %c0_i32 = arith.constant 0 : i32
    %c0_i32_0 = arith.constant 0 : i32
    return %arg0, %c0_i32 : i32, i32
  }
  func.func @transform_7(%arg0: i32) -> (i32, i32) {
    %c0_i32 = arith.constant 0 : i32
    %c0_i32_0 = arith.constant 0 : i32
    return %arg0, %c0_i32 : i32, i32
  }
}

</mosaic_0001>

<bundles_post_ra>
// kernel: tpu_custom_call.1
= control target key start
LH: loop header
LB: loop body
LE: loop exit
PB: predicated region body
PF: predicated region fallthrough
CT: control target
= control target key end

     0   :  { %13 = vsyncpa [#allocation3], 0  ;;  %vm205_vm0 = vcmask 1043456   ;;  %v2712_v6 = vmov 0   ;;  %vm180_vm1 = vcmask 64512   ;;  %s3964_s0 = inlined_call_operand.vmem [shape: f32[128,8], index: 0, kind: input, shape index: {}]   ;;  %s3965_s1 = inlined_call_operand.vmem [shape: bf16[8,2048], index: 1, kind: input, shape index: {}]   ;;  %s3966_s2 = inlined_call_operand.vmem [shape: f32[1,2048], index: 2, kind: input, shape index: {}]   ;;  %s3967_s3 = inlined_call_operand.vmem [shape: f32[1,1024], index: 3, kind: input, shape index: {}]   ;;  %s3968_s4 = inlined_call_operand.hbm [shape: bf16[128,1024], index: 4, kind: output, shape index: {0}]   ;;  %s3969_s5 = inlined_call_operand.hbm [shape: f32[128,1024], index: 5, kind: output, shape index: {1}]   ;;  %s3970_s6 = inlined_call_operand.vmem [shape: f32[128,1], index: 6, kind: output, shape index: {2}]   ;;  %s3971_s7 = inlined_call_operand.vmem [shape: f32[128,1], index: 7, kind: output, shape index: {3}]  }
   0x1   :  { %v48_v0 = vld [vmem:[%s3965_s1] sm:$0xff]  ;;  %v49_v1 = vld [vmem:[%s3965_s1 + $0x8] sm:$0xff]  ;;  %286 = vmatprep.mubr.bf16.mxu0 %v2712_v6  ;;  %v50_v9 = vld [vmem:[%s3965_s1 + $0x10] sm:$0xff]  ;;  %399 = vmatprep.mubr.bf16.mxu1 %v2712_v6 }
   0x2   :  { %v24_v2 = vld [vmem:[%s3964_s0] sm:$0xff]  ;;  %v2426_v3 = vcombine.high %v48_v0, %v48_v0  ;;  %v2425_v4 = vcombine.low %v48_v0, %v48_v0  ;;  %v2428_v5 = vcombine.high %v49_v1, %v49_v1  ;;  %v2427_v7 = vcombine.low %v49_v1, %v49_v1  ;;  %v25_v8 = vld [vmem:[%s3964_s0 + $0x8] sm:$0xff]  ;;  %v51_v10 = vld [vmem:[%s3965_s1 + $0x18] sm:$0xff] }
   0x3   :  { %v2430_v11 = vcombine.high %v50_v9, %v50_v9  ;;  %v2429_v12 = vcombine.low %v50_v9, %v50_v9  ;;  %v2432_v13 = vcombine.high %v51_v10, %v51_v10  ;;  %v2783_v16 = vpack.c.bf16 %v25_v8, %v24_v2  ;;  %v2792_v20 = vld [vmem:[%s3965_s1 + $0x20] sm:$0xff]  ;;  %v2803_v22 = vld [vmem:[%s3965_s1 + $0x28] sm:$0xff] }
   0x4   :  { %2441 = vmatprep.subr.msk.bf16.mxu0 %vm205_vm0, %v2426_v3  ;;  %v207_v14 = vsel %vm205_vm0, %v2425_v4, 0  ;;  %2450 = vmatprep.subr.msk.bf16.mxu1 %vm205_vm0, %v2428_v5  ;;  %v213_v15 = vsel %vm205_vm0, %v2427_v7, 0  ;;  %v2431_v17 = vcombine.low %v51_v10, %v51_v10  ;;  %v2434_v21 = vcombine.high %v2792_v20, %v2792_v20 }
   0x5   :  { %255 = vmatpush1.bf16.msra.mxu0 %v207_v14  ;;  %368 = vmatpush1.bf16.msra.mxu1 %v213_v15  ;;  %v219_v18 = vsel %vm205_vm0, %v2429_v12, 0 }
   0x6   :  { %2459 = vmatprep.subr.msk.bf16.mxu0 %vm205_vm0, %v2430_v11  ;;  %2468 = vmatprep.subr.msk.bf16.mxu1 %vm205_vm0, %v2432_v13  ;;  %v225_v19 = vsel %vm205_vm0, %v2431_v17, 0 }
   0x8   :  { %2442 = vmatmul.mubr.msk.bf16.vlgmr.msra.gmra.mrb[0].mxu0 %vm180_vm1, %v2783_v16  ;;  %2451 = vmatmul.mubr.msk.bf16.vlgmr.msra.gmra.mrb[0].mxu1 %vm180_vm1, %v2783_v16 }
   0x9   :  { %14 = vsyncpa [#allocation5], 0  ;;  %481 = vmatpush1.bf16.msra.mxu0 %v219_v18  ;;  %594 = vmatpush1.bf16.msra.mxu1 %v225_v19  ;;  %v26_v23 = vld [vmem:[%s3964_s0 + $0x10] sm:$0xff]  ;;  %v27_v24 = vld [vmem:[%s3964_s0 + $0x18] sm:$0xff]  ;;  %v2436_v25 = vcombine.high %v2803_v22, %v2803_v22  ;;  %v2433_v45 = vcombine.low %v2792_v20, %v2792_v20  ;;  %v2435_v46 = vcombine.low %v2803_v22, %v2803_v22  ;;  %v60_v57 = vlaneseq  ;;  %s2713_s8 = smov [#allocation2]  }
   0xa   :  { %296 = vmatprep.mubr.bf16.mxu0 %v2712_v6  ;;  %409 = vmatprep.mubr.bf16.mxu1 %v2712_v6  ;;  %v2817_v26 = vpack.c.bf16 %v27_v24, %v26_v23  ;;  %v28_v27 = vld [vmem:[%s3964_s0 + $0x20] sm:$0xff]  ;;  %v29_v28 = vld [vmem:[%s3964_s0 + $0x28] sm:$0xff]  ;;  %v30_v30 = vld [vmem:[%s3964_s0 + $0x30] sm:$0xff]  ;;  %vm1488_vm2 = vcmask 7168   ;;  %s2390_s9 = sshll.u32 %s2713_s8, 4  ;;  %s2391_s9 = int_to_ptr.vmem [resolvable:$true] %s2390_s9 }
   0xb   :  { %2477 = vmatprep.subr.msk.bf16.mxu0 %vm205_vm0, %v2434_v21  ;;  %2486 = vmatprep.subr.msk.bf16.mxu1 %vm205_vm0, %v2436_v25  ;;  %v2831_v29 = vpack.c.bf16 %v29_v28, %v28_v27  ;;  %v31_v31 = vld [vmem:[%s3964_s0 + $0x38] sm:$0xff]  ;;  %v32_v33 = vld [vmem:[%s3964_s0 + $0x40] sm:$0xff]  ;;  %v33_v34 = vld [vmem:[%s3964_s0 + $0x48] sm:$0xff]  ;;  %v231_v49 = vsel %vm205_vm0, %v2433_v45, 0  ;;  %v237_v50 = vsel %vm205_vm0, %v2435_v46, 0  ;;  %v3031_v58 = vshrl.u32 %v60_v57, 7  ;;  %p2669_p1 = scmp.lt.s32.totalorder %s2391_s9, %s2391_s9 }
   0xc   :  { %v2845_v32 = vpack.c.bf16 %v31_v31, %v30_v30  ;;  %v2859_v35 = vpack.c.bf16 %v33_v34, %v32_v33  ;;  %v34_v36 = vld [vmem:[%s3964_s0 + $0x50] sm:$0xff]  ;;  %v35_v37 = vld [vmem:[%s3964_s0 + $0x58] sm:$0xff]  ;;  %v36_v39 = vld [vmem:[%s3964_s0 + $0x60] sm:$0xff]  ;;  %s2664_s12 = scalar_lea.vmem %s2391_s9, 8192 }
   0xd   :  { %v2873_v38 = vpack.c.bf16 %v35_v37, %v34_v36  ;;  %v37_v40 = vld [vmem:[%s3964_s0 + $0x68] sm:$0xff]  ;;  %v38_v42 = vld [vmem:[%s3964_s0 + $0x70] sm:$0xff]  ;;  %v39_v43 = vld [vmem:[%s3964_s0 + $0x78] sm:$0xff]  ;;  %v3036_v59 = vsub.s32 0, %v3031_v58  ;;  %v3039_v60 = vsub.s32 2, %v3031_v58  ;;  %v3047_v62 = vsub.s32 1, %v3031_v58  ;;  %p2665_p0 = scmp.ne.s32.totalorder %s2391_s9, %s2664_s12  ;;  %p2670_p2 = scmp.lt.s32.totalorder %s2664_s12, %s2664_s12 }
   0xe   :  { %v2887_v41 = vpack.c.bf16 %v37_v40, %v36_v39  ;;  %v2901_v44 = vpack.c.bf16 %v39_v43, %v38_v42  ;;  %v54_v47 = vld [vmem:[%s3965_s1 + $0x30] sm:$0xff]  ;;  %v55_v48 = vld [vmem:[%s3965_s1 + $0x38] sm:$0xff]  ;;  %v3044_v61 = vld [vmem:[%s3966_s2] sm:$0xff]  ;;  %v3050_v63 = vsub.s32 3, %v3031_v58 }
   0xf   :  { %v2438_v51 = vcombine.high %v54_v47, %v54_v47  ;;  %v2440_v52 = vcombine.high %v55_v48, %v55_v48  ;;  %v2437_v53 = vcombine.low %v54_v47, %v54_v47  ;;  %v2439_v54 = vcombine.low %v55_v48, %v55_v48  ;;  %v3055_v0 = vld [vmem:[%s3967_s3] sm:$0xff]  ;;  %p2671_p3 = por %p2670_p2, %p2669_p1 }
  0x10   :  { %2443 = vmatmul.mubr.msk.bf16.gmra.mrb[4].mxu0 %vm180_vm1, %v2817_v26  ;;  %2452 = vmatmul.mubr.msk.bf16.gmra.mrb[4].mxu1 %vm180_vm1, %v2817_v26  ;;  %v3063_v1 = vrot.slane %v3044_v61, %v3036_v59  ;;  %v3067_v2 = vrot.slane %v3044_v61, %v3039_v60  ;;  %v3071_v3 = vrot.slane %v3044_v61, %v3047_v62 }
  0x11   :  { %306 = vmatprep.mubr.bf16.mxu0 %v2712_v6  ;;  %419 = vmatprep.mubr.bf16.mxu1 %v2712_v6  ;;  %v243_v55 = vsel %vm205_vm0, %v2437_v53, 0  ;;  %v249_v56 = vsel %vm205_vm0, %v2439_v54, 0  ;;  %v3075_v4 = vrot.slane %v3044_v61, %v3050_v63  ;;  %v3081_v5 = vrot.slane %v3055_v0, %v3036_v59  ;;  %p2672_p4 = pnand %p2671_p3, %p2665_p0 }
  0x12   :  { %v3085_v7 = vrot.slane %v3055_v0, %v3039_v60  ;;  %v3089_v9 = vrot.slane %v3055_v0, %v3047_v62  ;;  %v3093_v11 = vrot.slane %v3055_v0, %v3050_v63 }
  0x18   :  { %2444 = vmatmul.mubr.msk.bf16.gmra.mrb[8].mxu0 %vm180_vm1, %v2831_v29  ;;  %2453 = vmatmul.mubr.msk.bf16.gmra.mrb[8].mxu1 %vm180_vm1, %v2831_v29 }
  0x19   :  { %316 = vmatprep.mubr.bf16.mxu0 %v2712_v6  ;;  %429 = vmatprep.mubr.bf16.mxu1 %v2712_v6 }
  0x20   :  { %2445 = vmatmul.mubr.msk.bf16.gmra.mrb[12].mxu0 %vm180_vm1, %v2845_v32  ;;  %2454 = vmatmul.mubr.msk.bf16.gmra.mrb[12].mxu1 %vm180_vm1, %v2845_v32 }
  0x21   :  { %326 = vmatprep.mubr.bf16.mxu0 %v2712_v6  ;;  %439 = vmatprep.mubr.bf16.mxu1 %v2712_v6 }
  0x28   :  { %2446 = vmatmul.mubr.msk.bf16.gmra.mrb[16].mxu0 %vm180_vm1, %v2859_v35  ;;  %2455 = vmatmul.mubr.msk.bf16.gmra.mrb[16].mxu1 %vm180_vm1, %v2859_v35 }
  0x29   :  { %336 = vmatprep.mubr.bf16.mxu0 %v2712_v6  ;;  %449 = vmatprep.mubr.bf16.mxu1 %v2712_v6 }
  0x30   :  { %2447 = vmatmul.mubr.msk.bf16.gmra.mrb[20].mxu0 %vm180_vm1, %v2873_v38  ;;  %2456 = vmatmul.mubr.msk.bf16.gmra.mrb[20].mxu1 %vm180_vm1, %v2873_v38 }
  0x31   :  { %346 = vmatprep.mubr.bf16.mxu0 %v2712_v6  ;;  %459 = vmatprep.mubr.bf16.mxu1 %v2712_v6 }
  0x38   :  { %2448 = vmatmul.mubr.msk.bf16.gmra.mrb[24].mxu0 %vm180_vm1, %v2887_v41  ;;  %2457 = vmatmul.mubr.msk.bf16.gmra.mrb[24].mxu1 %vm180_vm1, %v2887_v41 }
  0x39   :  { %356 = vmatprep.mubr.bf16.mxu0 %v2712_v6  ;;  %469 = vmatprep.mubr.bf16.mxu1 %v2712_v6 }
  0x40   :  { %2449 = vmatmul.mubr.msk.bf16.gmra.mrb[28].mxu0 %vm180_vm1, %v2901_v44  ;;  %2458 = vmatmul.mubr.msk.bf16.gmra.mrb[28].mxu1 %vm180_vm1, %v2901_v44 }
  0x41   :  { %512 = vmatprep.mubr.bf16.mxu0 %v2712_v6  ;;  %625 = vmatprep.mubr.bf16.mxu1 %v2712_v6 }
  0x48   :  { %2460 = vmatmul.mubr.msk.bf16.vlgmr.msra.gmra.mrb[32].mxu0 %vm180_vm1, %v2783_v16  ;;  %2469 = vmatmul.mubr.msk.bf16.vlgmr.msra.gmra.mrb[32].mxu1 %vm180_vm1, %v2783_v16 }
  0x49   :  { %707 = vmatpush1.bf16.msra.mxu0 %v231_v49  ;;  %820 = vmatpush1.bf16.msra.mxu1 %v237_v50 }
  0x4a   :  { %522 = vmatprep.mubr.bf16.mxu0 %v2712_v6  ;;  %635 = vmatprep.mubr.bf16.mxu1 %v2712_v6 }
  0x4b   :  { %2495 = vmatprep.subr.msk.bf16.mxu0 %vm205_vm0, %v2438_v51  ;;  %2504 = vmatprep.subr.msk.bf16.mxu1 %vm205_vm0, %v2440_v52 }
  0x50   :  { %2461 = vmatmul.mubr.msk.bf16.gmra.mrb[36].mxu0 %vm180_vm1, %v2817_v26  ;;  %2470 = vmatmul.mubr.msk.bf16.gmra.mrb[36].mxu1 %vm180_vm1, %v2817_v26 }
  0x51   :  { %532 = vmatprep.mubr.bf16.mxu0 %v2712_v6  ;;  %645 = vmatprep.mubr.bf16.mxu1 %v2712_v6 }
  0x58   :  { %2462 = vmatmul.mubr.msk.bf16.gmra.mrb[40].mxu0 %vm180_vm1, %v2831_v29  ;;  %2471 = vmatmul.mubr.msk.bf16.gmra.mrb[40].mxu1 %vm180_vm1, %v2831_v29 }
  0x59   :  { %542 = vmatprep.mubr.bf16.mxu0 %v2712_v6  ;;  %655 = vmatprep.mubr.bf16.mxu1 %v2712_v6 }
  0x60   :  { %2463 = vmatmul.mubr.msk.bf16.gmra.mrb[44].mxu0 %vm180_vm1, %v2845_v32  ;;  %2472 = vmatmul.mubr.msk.bf16.gmra.mrb[44].mxu1 %vm180_vm1, %v2845_v32 }
  0x61   :  { %552 = vmatprep.mubr.bf16.mxu0 %v2712_v6  ;;  %665 = vmatprep.mubr.bf16.mxu1 %v2712_v6 }
  0x68   :  { %2464 = vmatmul.mubr.msk.bf16.gmra.mrb[48].mxu0 %vm180_vm1, %v2859_v35  ;;  %2473 = vmatmul.mubr.msk.bf16.gmra.mrb[48].mxu1 %vm180_vm1, %v2859_v35 }
  0x69   :  { %562 = vmatprep.mubr.bf16.mxu0 %v2712_v6  ;;  %675 = vmatprep.mubr.bf16.mxu1 %v2712_v6 }
  0x70   :  { %2465 = vmatmul.mubr.msk.bf16.gmra.mrb[52].mxu0 %vm180_vm1, %v2873_v38  ;;  %2474 = vmatmul.mubr.msk.bf16.gmra.mrb[52].mxu1 %vm180_vm1, %v2873_v38 }
  0x71   :  { %572 = vmatprep.mubr.bf16.mxu0 %v2712_v6  ;;  %685 = vmatprep.mubr.bf16.mxu1 %v2712_v6 }
  0x78   :  { %2466 = vmatmul.mubr.msk.bf16.gmra.mrb[56].mxu0 %vm180_vm1, %v2887_v41  ;;  %2475 = vmatmul.mubr.msk.bf16.gmra.mrb[56].mxu1 %vm180_vm1, %v2887_v41 }
  0x79   :  { %582 = vmatprep.mubr.bf16.mxu0 %v2712_v6  ;;  %695 = vmatprep.mubr.bf16.mxu1 %v2712_v6 }
  0x80   :  { %2467 = vmatmul.mubr.msk.bf16.gmra.mrb[60].mxu0 %vm180_vm1, %v2901_v44  ;;  %2476 = vmatmul.mubr.msk.bf16.gmra.mrb[60].mxu1 %vm180_vm1, %v2901_v44 }
  0x81   :  { %738 = vmatprep.mubr.bf16.mxu0 %v2712_v6  ;;  %851 = vmatprep.mubr.bf16.mxu1 %v2712_v6 }
  0x88   :  { %2478 = vmatmul.mubr.msk.bf16.vlgmr.msra.gmra.mrb[64].mxu0 %vm180_vm1, %v2783_v16  ;;  %2487 = vmatmul.mubr.msk.bf16.vlgmr.msra.gmra.mrb[64].mxu1 %vm180_vm1, %v2783_v16 }
  0x89   :  { %933 = vmatpush1.bf16.msra.mxu0 %v243_v55  ;;  %1046 = vmatpush1.bf16.msra.mxu1 %v249_v56 }
  0x8a   :  { %748 = vmatprep.mubr.bf16.mxu0 %v2712_v6  ;;  %861 = vmatprep.mubr.bf16.mxu1 %v2712_v6 }
  0x90   :  { %2479 = vmatmul.mubr.msk.bf16.gmra.mrb[68].mxu0 %vm180_vm1, %v2817_v26  ;;  %2488 = vmatmul.mubr.msk.bf16.gmra.mrb[68].mxu1 %vm180_vm1, %v2817_v26 }
  0x91   :  { %758 = vmatprep.mubr.bf16.mxu0 %v2712_v6  ;;  %871 = vmatprep.mubr.bf16.mxu1 %v2712_v6 }
  0x98   :  { %2480 = vmatmul.mubr.msk.bf16.gmra.mrb[72].mxu0 %vm180_vm1, %v2831_v29  ;;  %2489 = vmatmul.mubr.msk.bf16.gmra.mrb[72].mxu1 %vm180_vm1, %v2831_v29 }
  0x99   :  { %768 = vmatprep.mubr.bf16.mxu0 %v2712_v6  ;;  %881 = vmatprep.mubr.bf16.mxu1 %v2712_v6 }
  0xa0   :  { %2481 = vmatmul.mubr.msk.bf16.gmra.mrb[76].mxu0 %vm180_vm1, %v2845_v32  ;;  %2490 = vmatmul.mubr.msk.bf16.gmra.mrb[76].mxu1 %vm180_vm1, %v2845_v32 }
  0xa1   :  { %778 = vmatprep.mubr.bf16.mxu0 %v2712_v6  ;;  %891 = vmatprep.mubr.bf16.mxu1 %v2712_v6 }
  0xa8   :  { %2482 = vmatmul.mubr.msk.bf16.gmra.mrb[80].mxu0 %vm180_vm1, %v2859_v35  ;;  %2491 = vmatmul.mubr.msk.bf16.gmra.mrb[80].mxu1 %vm180_vm1, %v2859_v35 }
  0xa9   :  { %788 = vmatprep.mubr.bf16.mxu0 %v2712_v6  ;;  %901 = vmatprep.mubr.bf16.mxu1 %v2712_v6 }
  0xb0   :  { %2483 = vmatmul.mubr.msk.bf16.gmra.mrb[84].mxu0 %vm180_vm1, %v2873_v38  ;;  %2492 = vmatmul.mubr.msk.bf16.gmra.mrb[84].mxu1 %vm180_vm1, %v2873_v38 }
  0xb1   :  { %798 = vmatprep.mubr.bf16.mxu0 %v2712_v6  ;;  %911 = vmatprep.mubr.bf16.mxu1 %v2712_v6 }
  0xb8   :  { %2484 = vmatmul.mubr.msk.bf16.gmra.mrb[88].mxu0 %vm180_vm1, %v2887_v41  ;;  %2493 = vmatmul.mubr.msk.bf16.gmra.mrb[88].mxu1 %vm180_vm1, %v2887_v41 }
  0xb9   :  { %808 = vmatprep.mubr.bf16.mxu0 %v2712_v6  ;;  %921 = vmatprep.mubr.bf16.mxu1 %v2712_v6 }
  0xc0   :  { %2485 = vmatmul.mubr.msk.bf16.gmra.mrb[92].mxu0 %vm180_vm1, %v2901_v44  ;;  %2494 = vmatmul.mubr.msk.bf16.gmra.mrb[92].mxu1 %vm180_vm1, %v2901_v44 }
  0xc1   :  { %964 = vmatprep.mubr.bf16.mxu0 %v2712_v6  ;;  %1077 = vmatprep.mubr.bf16.mxu1 %v2712_v6 }
  0xc8   :  { %2496 = vmatmul.mubr.msk.bf16.vlgmr.msra.gmra.mrb[96].mxu0 %vm180_vm1, %v2783_v16  ;;  %2505 = vmatmul.mubr.msk.bf16.vlgmr.msra.gmra.mrb[96].mxu1 %vm180_vm1, %v2783_v16 }
  0xc9   :  { %974 = vmatprep.mubr.bf16.mxu0 %v2712_v6  ;;  %1087 = vmatprep.mubr.bf16.mxu1 %v2712_v6 }
  0xd0   :  { %2497 = vmatmul.mubr.msk.bf16.gmra.mrb[100].mxu0 %vm180_vm1, %v2817_v26  ;;  %2506 = vmatmul.mubr.msk.bf16.gmra.mrb[100].mxu1 %vm180_vm1, %v2817_v26 }
  0xd1   :  { %984 = vmatprep.mubr.bf16.mxu0 %v2712_v6  ;;  %1097 = vmatprep.mubr.bf16.mxu1 %v2712_v6 }
  0xd8   :  { %2498 = vmatmul.mubr.msk.bf16.gmra.mrb[104].mxu0 %vm180_vm1, %v2831_v29  ;;  %2507 = vmatmul.mubr.msk.bf16.gmra.mrb[104].mxu1 %vm180_vm1, %v2831_v29 }
  0xd9   :  { %994 = vmatprep.mubr.bf16.mxu0 %v2712_v6  ;;  %1107 = vmatprep.mubr.bf16.mxu1 %v2712_v6 }
  0xdb   :  { %v288_v8 = vpop.f32.mrb[0].mxu0  ;;  %v401_v10 = vpop.f32.mrb[0].mxu1 }
  0xdc   :  { %v289_v12 = vadd.f32 %v288_v8, %v3063_v1  ;;  %v290_v13 = vpop.f32.mrb[1].mxu0  ;;  %v402_v14 = vadd.f32 %v401_v10, %v3067_v2  ;;  %v403_v15 = vpop.f32.mrb[1].mxu1 }
  0xdd   :  { %v291_v16 = vadd.f32 %v290_v13, %v3071_v3  ;;  %v292_v17 = vpop.f32.mrb[2].mxu0  ;;  %v404_v18 = vadd.f32 %v403_v15, %v3075_v4  ;;  %v405_v19 = vpop.f32.mrb[2].mxu1 }
  0xde   :  { %v1200_v20 = vmul.f32 %v3081_v5, %v289_v12  ;;  %v293_v21 = vadd.f32 %v292_v17, %v3063_v1  ;;  %v1202_v22 = vmul.f32 %v3085_v7, %v402_v14  ;;  %v294_v23 = vpop.f32.mrb[3].mxu0  ;;  %v406_v24 = vadd.f32 %v405_v19, %v3067_v2  ;;  %v407_v25 = vpop.f32.mrb[3].mxu1 }
  0xdf   :  { %v1201_v26 = vmul.f32 %v3089_v9, %v291_v16  ;;  %v2577_v27 = vpack.c.bf16 %v291_v16, %v289_v12  ;;  %v295_v28 = vadd.f32 %v294_v23, %v3071_v3  ;;  %v1203_v29 = vmul.f32 %v3093_v11, %v404_v18 }
  0xe0   :  { %v1208_v30 = vmul.f32 %v3081_v5, %v293_v21  ;;  %v2578_v31 = vpack.c.bf16 %v404_v18, %v402_v14  ;;  %v1210_v33 = vmul.f32 %v3085_v7, %v406_v24  ;;  %v408_v34 = vadd.f32 %v407_v25, %v3075_v4  ;;  %2499 = vmatmul.mubr.msk.bf16.gmra.mrb[108].mxu0 %vm180_vm1, %v2845_v32 }
  0xe1   :  { %v1328_v36 = vadd.f32 %v1201_v26, %v1200_v20  ;;  %2193 = vst [vmem:[#allocation2] sm:$0xff] %v2577_v27  ;;  %v1209_v37 = vmul.f32 %v3089_v9, %v295_v28  ;;  %v2581_v39 = vpack.c.bf16 %v295_v28, %v293_v21  ;;  %2508 = vmatmul.mubr.msk.bf16.gmra.mrb[108].mxu1 %vm180_vm1, %v2845_v32 }
  0xe2   :  { %1004 = vmatprep.mubr.bf16.mxu0 %v2712_v6  ;;  %2194 = vst [vmem:[#allocation2 + $0x8] sm:$0xff] %v2578_v31  ;;  %v2582_v40 = vpack.c.bf16 %v408_v34, %v406_v24  ;;  %1117 = vmatprep.mubr.bf16.mxu1 %v2712_v6  ;;  %v1211_v47 = vmul.f32 %v3093_v11, %v408_v34 }
  0xe3   :  { %v1329_v42 = vadd.f32 %v1328_v36, %v1202_v22  ;;  %v1337_v43 = vadd.f32 %v1209_v37, %v1208_v30  ;;  %2197 = vst [vmem:[#allocation2 + $0x20] sm:$0xff] %v2581_v39  ;;  %v298_v45 = vpop.f32.mrb[4].mxu0  ;;  %v411_v46 = vpop.f32.mrb[4].mxu1 }
  0xe4   :  { %2198 = vst [vmem:[#allocation2 + $0x28] sm:$0xff] %v2582_v40  ;;  %v299_v48 = vadd.f32 %v298_v45, %v3063_v1  ;;  %v300_v49 = vpop.f32.mrb[5].mxu0  ;;  %v412_v50 = vadd.f32 %v411_v46, %v3067_v2  ;;  %v413_v32 = vpop.f32.mrb[5].mxu1 }
  0xe5   :  { %v3119_v51 = vadd.f32 %v1329_v42, %v1203_v29  ;;  %v1338_v52 = vadd.f32 %v1337_v43, %v1210_v33  ;;  %v301_v53 = vadd.f32 %v300_v49, %v3071_v3  ;;  %v302_v54 = vpop.f32.mrb[6].mxu0  ;;  %v414_v55 = vadd.f32 %v413_v32, %v3075_v4  ;;  %v415_v56 = vpop.f32.mrb[6].mxu1 }
  0xe6   :  { %v1216_v57 = vmul.f32 %v3081_v5, %v299_v48  ;;  %v303_v8 = vadd.f32 %v302_v54, %v3063_v1  ;;  %v1218_v10 = vmul.f32 %v3085_v7, %v412_v50  ;;  %v304_v12 = vpop.f32.mrb[7].mxu0  ;;  %v416_v13 = vadd.f32 %v415_v56, %v3067_v2  ;;  %v417_v14 = vpop.f32.mrb[7].mxu1 }
  0xe7   :  { %v3127_v15 = vadd.f32 %v1338_v52, %v1211_v47  ;;  %v1217_v16 = vmul.f32 %v3089_v9, %v301_v53  ;;  %v2585_v17 = vpack.c.bf16 %v301_v53, %v299_v48  ;;  %v305_v18 = vadd.f32 %v304_v12, %v3071_v3 }
  0xe8   :  { %v1224_v19 = vmul.f32 %v3081_v5, %v303_v8  ;;  %v1219_v20 = vmul.f32 %v3093_v11, %v414_v55  ;;  %v2586_v21 = vpack.c.bf16 %v414_v55, %v412_v50  ;;  %v1226_v22 = vmul.f32 %v3085_v7, %v416_v13  ;;  %2500 = vmatmul.mubr.msk.bf16.gmra.mrb[112].mxu0 %vm180_vm1, %v2859_v35 }
  0xe9   :  { %v1346_v23 = vadd.f32 %v1217_v16, %v1216_v57  ;;  %2201 = vst [vmem:[#allocation2 + $0x40] sm:$0xff] %v2585_v17  ;;  %v1225_v24 = vmul.f32 %v3089_v9, %v305_v18  ;;  %v2589_v25 = vpack.c.bf16 %v305_v18, %v303_v8  ;;  %v418_v26 = vadd.f32 %v417_v14, %v3075_v4 }
  0xea   :  { %2509 = vmatmul.mubr.msk.bf16.gmra.mrb[112].mxu1 %vm180_vm1, %v2859_v35  ;;  %2202 = vst [vmem:[#allocation2 + $0x48] sm:$0xff] %v2586_v21  ;;  %1014 = vmatprep.mubr.bf16.mxu0 %v2712_v6 }
  0xeb   :  { %1127 = vmatprep.mubr.bf16.mxu1 %v2712_v6  ;;  %v1347_v27 = vadd.f32 %v1346_v23, %v1218_v10  ;;  %v1355_v28 = vadd.f32 %v1225_v24, %v1224_v19  ;;  %2205 = vst [vmem:[#allocation2 + $0x60] sm:$0xff] %v2589_v25  ;;  %v2590_v29 = vpack.c.bf16 %v418_v26, %v416_v13  ;;  %v308_v30 = vpop.f32.mrb[8].mxu0  ;;  %v421_v31 = vpop.f32.mrb[8].mxu1 }
  0xec   :  { %v1227_v33 = vmul.f32 %v3093_v11, %v418_v26  ;;  %v309_v34 = vadd.f32 %v308_v30, %v3063_v1  ;;  %v310_v36 = vpop.f32.mrb[9].mxu0  ;;  %v422_v37 = vadd.f32 %v421_v31, %v3067_v2  ;;  %v423_v39 = vpop.f32.mrb[9].mxu1 }
  0xed   :  { %v3145_v35 = vadd.f32 %v1347_v27, %v1219_v20  ;;  %v1356_v40 = vadd.f32 %v1355_v28, %v1226_v22  ;;  %2206 = vst [vmem:[#allocation2 + $0x68] sm:$0xff] %v2590_v29  ;;  %v311_v42 = vadd.f32 %v310_v36, %v3071_v3  ;;  %v312_v43 = vpop.f32.mrb[10].mxu0  ;;  %v424_v45 = vadd.f32 %v423_v39, %v3075_v4  ;;  %v425_v46 = vpop.f32.mrb[10].mxu1 }
  0xee   :  { %v1232_v47 = vmul.f32 %v3081_v5, %v309_v34  ;;  %v313_v48 = vadd.f32 %v312_v43, %v3063_v1  ;;  %v1234_v49 = vmul.f32 %v3085_v7, %v422_v37  ;;  %v314_v50 = vpop.f32.mrb[11].mxu0  ;;  %v426_v32 = vadd.f32 %v425_v46, %v3067_v2  ;;  %v427_v52 = vpop.f32.mrb[11].mxu1 }
  0xef   :  { %v3153_v53 = vadd.f32 %v1356_v40, %v1227_v33  ;;  %v1233_v54 = vmul.f32 %v3089_v9, %v311_v42  ;;  %v2593_v55 = vpack.c.bf16 %v311_v42, %v309_v34  ;;  %v315_v56 = vadd.f32 %v314_v50, %v3071_v3 }
  0xf0   :  { %v1240_v57 = vmul.f32 %v3081_v5, %v313_v48  ;;  %v1235_v8 = vmul.f32 %v3093_v11, %v424_v45  ;;  %v2594_v10 = vpack.c.bf16 %v424_v45, %v422_v37  ;;  %v1242_v12 = vmul.f32 %v3085_v7, %v426_v32  ;;  %2501 = vmatmul.mubr.msk.bf16.gmra.mrb[116].mxu0 %vm180_vm1, %v2873_v38 }
  0xf1   :  { %v1364_v13 = vadd.f32 %v1233_v54, %v1232_v47  ;;  %2209 = vst [vmem:[#allocation2 + $0x80] sm:$0xff] %v2593_v55  ;;  %v1241_v14 = vmul.f32 %v3089_v9, %v315_v56  ;;  %v2597_v16 = vpack.c.bf16 %v315_v56, %v313_v48  ;;  %v428_v17 = vadd.f32 %v427_v52, %v3075_v4 }
  0xf2   :  { %2510 = vmatmul.mubr.msk.bf16.gmra.mrb[116].mxu1 %vm180_vm1, %v2873_v38  ;;  %2210 = vst [vmem:[#allocation2 + $0x88] sm:$0xff] %v2594_v10  ;;  %1024 = vmatprep.mubr.bf16.mxu0 %v2712_v6 }
  0xf3   :  { %1137 = vmatprep.mubr.bf16.mxu1 %v2712_v6  ;;  %v1365_v18 = vadd.f32 %v1364_v13, %v1234_v49  ;;  %v1373_v19 = vadd.f32 %v1241_v14, %v1240_v57  ;;  %2213 = vst [vmem:[#allocation2 + $0xa0] sm:$0xff] %v2597_v16  ;;  %v2598_v20 = vpack.c.bf16 %v428_v17, %v426_v32  ;;  %v318_v21 = vpop.f32.mrb[12].mxu0  ;;  %v431_v22 = vpop.f32.mrb[12].mxu1 }
  0xf4   :  { %v1243_v23 = vmul.f32 %v3093_v11, %v428_v17  ;;  %v319_v24 = vadd.f32 %v318_v21, %v3063_v1  ;;  %v320_v25 = vpop.f32.mrb[13].mxu0  ;;  %v432_v26 = vadd.f32 %v431_v22, %v3067_v2  ;;  %v433_v27 = vpop.f32.mrb[13].mxu1 }
  0xf5   :  { %v3171_v38 = vadd.f32 %v1365_v18, %v1235_v8  ;;  %v1374_v28 = vadd.f32 %v1373_v19, %v1242_v12  ;;  %2214 = vst [vmem:[#allocation2 + $0xa8] sm:$0xff] %v2598_v20  ;;  %v321_v29 = vadd.f32 %v320_v25, %v3071_v3  ;;  %v322_v30 = vpop.f32.mrb[14].mxu0  ;;  %v434_v31 = vadd.f32 %v433_v27, %v3075_v4  ;;  %v435_v33 = vpop.f32.mrb[14].mxu1 }
  0xf6   :  { %v1248_v34 = vmul.f32 %v3081_v5, %v319_v24  ;;  %v323_v36 = vadd.f32 %v322_v30, %v3063_v1  ;;  %v1250_v37 = vmul.f32 %v3085_v7, %v432_v26  ;;  %v324_v39 = vpop.f32.mrb[15].mxu0  ;;  %v436_v40 = vadd.f32 %v435_v33, %v3067_v2  ;;  %v437_v42 = vpop.f32.mrb[15].mxu1 }
  0xf7   :  { %v3179_v43 = vadd.f32 %v1374_v28, %v1243_v23  ;;  %v1249_v45 = vmul.f32 %v3089_v9, %v321_v29  ;;  %v2601_v46 = vpack.c.bf16 %v321_v29, %v319_v24  ;;  %v325_v47 = vadd.f32 %v324_v39, %v3071_v3 }
  0xf8   :  { %v1256_v48 = vmul.f32 %v3081_v5, %v323_v36  ;;  %v1251_v49 = vmul.f32 %v3093_v11, %v434_v31  ;;  %v2602_v50 = vpack.c.bf16 %v434_v31, %v432_v26  ;;  %v1258_v32 = vmul.f32 %v3085_v7, %v436_v40  ;;  %2502 = vmatmul.mubr.msk.bf16.gmra.mrb[120].mxu0 %vm180_vm1, %v2887_v41 }
  0xf9   :  { %v1382_v52 = vadd.f32 %v1249_v45, %v1248_v34  ;;  %2217 = vst [vmem:[#allocation2 + $0xc0] sm:$0xff] %v2601_v46  ;;  %v1257_v54 = vmul.f32 %v3089_v9, %v325_v47  ;;  %v2605_v55 = vpack.c.bf16 %v325_v47, %v323_v36  ;;  %v438_v56 = vadd.f32 %v437_v42, %v3075_v4 }
  0xfa   :  { %2511 = vmatmul.mubr.msk.bf16.gmra.mrb[120].mxu1 %vm180_vm1, %v2887_v41  ;;  %2218 = vst [vmem:[#allocation2 + $0xc8] sm:$0xff] %v2602_v50  ;;  %1034 = vmatprep.mubr.bf16.mxu0 %v2712_v6 }
  0xfb   :  { %1147 = vmatprep.mubr.bf16.mxu1 %v2712_v6  ;;  %v1383_v57 = vadd.f32 %v1382_v52, %v1250_v37  ;;  %v1391_v8 = vadd.f32 %v1257_v54, %v1256_v48  ;;  %2221 = vst [vmem:[#allocation2 + $0xe0] sm:$0xff] %v2605_v55  ;;  %v2606_v10 = vpack.c.bf16 %v438_v56, %v436_v40  ;;  %v328_v12 = vpop.f32.mrb[16].mxu0  ;;  %v441_v13 = vpop.f32.mrb[16].mxu1 }
  0xfc   :  { %v1259_v14 = vmul.f32 %v3093_v11, %v438_v56  ;;  %v329_v16 = vadd.f32 %v328_v12, %v3063_v1  ;;  %v330_v17 = vpop.f32.mrb[17].mxu0  ;;  %v442_v18 = vadd.f32 %v441_v13, %v3067_v2  ;;  %v443_v19 = vpop.f32.mrb[17].mxu1 }
  0xfd   :  { %v3197_v41 = vadd.f32 %v1383_v57, %v1251_v49  ;;  %v1392_v20 = vadd.f32 %v1391_v8, %v1258_v32  ;;  %2222 = vst [vmem:[#allocation2 + $0xe8] sm:$0xff] %v2606_v10  ;;  %v331_v6 = vadd.f32 %v330_v17, %v3071_v3  ;;  %v332_v21 = vpop.f32.mrb[18].mxu0  ;;  %v444_v22 = vadd.f32 %v443_v19, %v3075_v4  ;;  %v445_v23 = vpop.f32.mrb[18].mxu1 }
  0xfe   :  { %v1264_v24 = vmul.f32 %v3081_v5, %v329_v16  ;;  %v333_v25 = vadd.f32 %v332_v21, %v3063_v1  ;;  %v1266_v26 = vmul.f32 %v3085_v7, %v442_v18  ;;  %v334_v27 = vpop.f32.mrb[19].mxu0  ;;  %v446_v28 = vadd.f32 %v445_v23, %v3067_v2  ;;  %v447_v29 = vpop.f32.mrb[19].mxu1 }
  0xff   :  { %v3205_v30 = vadd.f32 %v1392_v20, %v1259_v14  ;;  %v1265_v31 = vmul.f32 %v3089_v9, %v331_v6  ;;  %v2609_v33 = vpack.c.bf16 %v331_v6, %v329_v16  ;;  %v335_v34 = vadd.f32 %v334_v27, %v3071_v3 }
 0x100   :  { %v1272_v36 = vmul.f32 %v3081_v5, %v333_v25  ;;  %v1267_v37 = vmul.f32 %v3093_v11, %v444_v22  ;;  %v2610_v39 = vpack.c.bf16 %v444_v22, %v442_v18  ;;  %v1274_v40 = vmul.f32 %v3085_v7, %v446_v28  ;;  %2503 = vmatmul.mubr.msk.bf16.gmra.mrb[124].mxu0 %vm180_vm1, %v2901_v44 }
 0x101   :  { %v1400_v42 = vadd.f32 %v1265_v31, %v1264_v24  ;;  %2225 = vst [vmem:[#allocation2 + $0x100] sm:$0xff] %v2609_v33  ;;  %v1273_v45 = vmul.f32 %v3089_v9, %v335_v34  ;;  %v2613_v46 = vpack.c.bf16 %v335_v34, %v333_v25  ;;  %v448_v47 = vadd.f32 %v447_v29, %v3075_v4 }
 0x102   :  { %2512 = vmatmul.mubr.msk.bf16.gmra.mrb[124].mxu1 %vm180_vm1, %v2901_v44  ;;  %2226 = vst [vmem:[#allocation2 + $0x108] sm:$0xff] %v2610_v39  ;;  %v3242_v39 = vsub.s32 5, %v3031_v58 }
 0x103   :  { %v1401_v48 = vadd.f32 %v1400_v42, %v1266_v26  ;;  %v1409_v49 = vadd.f32 %v1273_v45, %v1272_v36  ;;  %2229 = vst [vmem:[#allocation2 + $0x120] sm:$0xff] %v2613_v46  ;;  %v2614_v50 = vpack.c.bf16 %v448_v47, %v446_v28  ;;  %v338_v32 = vpop.f32.mrb[20].mxu0  ;;  %v451_v52 = vpop.f32.mrb[20].mxu1  ;;  %v1275_v54 = vmul.f32 %v3093_v11, %v448_v47 }
 0x104   :  { %v339_v55 = vadd.f32 %v338_v32, %v3063_v1  ;;  %v340_v56 = vpop.f32.mrb[21].mxu0  ;;  %v452_v57 = vadd.f32 %v451_v52, %v3067_v2  ;;  %v453_v8 = vpop.f32.mrb[21].mxu1 }
 0x105   :  { %v3221_v10 = vadd.f32 %v1401_v48, %v1267_v37  ;;  %v1410_v12 = vadd.f32 %v1409_v49, %v1274_v40  ;;  %2230 = vst [vmem:[#allocation2 + $0x128] sm:$0xff] %v2614_v50  ;;  %v341_v44 = vadd.f32 %v340_v56, %v3071_v3  ;;  %v342_v13 = vpop.f32.mrb[22].mxu0  ;;  %v454_v14 = vadd.f32 %v453_v8, %v3075_v4  ;;  %v455_v16 = vpop.f32.mrb[22].mxu1 }
 0x106   :  { %v1280_v17 = vmul.f32 %v3081_v5, %v339_v55  ;;  %v343_v18 = vadd.f32 %v342_v13, %v3063_v1  ;;  %v1282_v19 = vmul.f32 %v3085_v7, %v452_v57  ;;  %v344_v20 = vpop.f32.mrb[23].mxu0  ;;  %v456_v6 = vadd.f32 %v455_v16, %v3067_v2  ;;  %v457_v21 = vpop.f32.mrb[23].mxu1 }
 0x107   :  { %v3229_v22 = vadd.f32 %v1410_v12, %v1275_v54  ;;  %v1281_v23 = vmul.f32 %v3089_v9, %v341_v44  ;;  %v2617_v24 = vpack.c.bf16 %v341_v44, %v339_v55  ;;  %v345_v25 = vadd.f32 %v344_v20, %v3071_v3 }
 0x108   :  { %v1288_v26 = vmul.f32 %v3081_v5, %v343_v18  ;;  %v1283_v27 = vmul.f32 %v3093_v11, %v454_v14  ;;  %v2618_v28 = vpack.c.bf16 %v454_v14, %v452_v57  ;;  %v1290_v29 = vmul.f32 %v3085_v7, %v456_v6 }
 0x109   :  { %v1418_v31 = vadd.f32 %v1281_v23, %v1280_v17  ;;  %2233 = vst [vmem:[#allocation2 + $0x140] sm:$0xff] %v2617_v24  ;;  %v1289_v33 = vmul.f32 %v3089_v9, %v345_v25  ;;  %v2621_v34 = vpack.c.bf16 %v345_v25, %v343_v18  ;;  %v458_v36 = vadd.f32 %v457_v21, %v3075_v4 }
 0x10a   :  { %2234 = vst [vmem:[#allocation2 + $0x148] sm:$0xff] %v2618_v28  ;;  %v3239_v37 = vsub.s32 4, %v3031_v58  ;;  %v3245_v48 = vsub.s32 6, %v3031_v58  ;;  %v3251_v55 = vsub.s32 7, %v3031_v58 }
 0x10b   :  { %v1419_v40 = vadd.f32 %v1418_v31, %v1282_v19  ;;  %v1427_v42 = vadd.f32 %v1289_v33, %v1288_v26  ;;  %2237 = vst [vmem:[#allocation2 + $0x160] sm:$0xff] %v2621_v34  ;;  %v2622_v45 = vpack.c.bf16 %v458_v36, %v456_v6  ;;  %v348_v46 = vpop.f32.mrb[24].mxu0  ;;  %v461_v47 = vpop.f32.mrb[24].mxu1  ;;  %v1291_v49 = vmul.f32 %v3093_v11, %v458_v36 }
 0x10c   :  { %v349_v50 = vadd.f32 %v348_v46, %v3063_v1  ;;  %v350_v32 = vpop.f32.mrb[25].mxu0  ;;  %v462_v52 = vadd.f32 %v461_v47, %v3067_v2  ;;  %v463_v54 = vpop.f32.mrb[25].mxu1  ;;  %v3272_v34 = vrot.slane %v3044_v61, %v3239_v37  ;;  %v3276_v36 = vrot.slane %v3044_v61, %v3242_v39 }
 0x10d   :  { %v3253_v56 = vadd.f32 %v1419_v40, %v1283_v27  ;;  %v1428_v57 = vadd.f32 %v1427_v42, %v1290_v29  ;;  %2238 = vst [vmem:[#allocation2 + $0x168] sm:$0xff] %v2622_v45  ;;  %v351_v8 = vadd.f32 %v350_v32, %v3071_v3  ;;  %v352_v12 = vpop.f32.mrb[26].mxu0  ;;  %v464_v44 = vadd.f32 %v463_v54, %v3075_v4  ;;  %v465_v13 = vpop.f32.mrb[26].mxu1 }
 0x10e   :  { %v1296_v14 = vmul.f32 %v3081_v5, %v349_v50  ;;  %v353_v16 = vadd.f32 %v352_v12, %v3063_v1  ;;  %v1298_v17 = vmul.f32 %v3085_v7, %v462_v52  ;;  %v354_v18 = vpop.f32.mrb[27].mxu0  ;;  %v466_v58 = vadd.f32 %v465_v13, %v3067_v2  ;;  %v467_v19 = vpop.f32.mrb[27].mxu1 }
 0x10f   :  { %v3261_v20 = vadd.f32 %v1428_v57, %v1291_v49  ;;  %v1297_v6 = vmul.f32 %v3089_v9, %v351_v8  ;;  %v2625_v21 = vpack.c.bf16 %v351_v8, %v349_v50  ;;  %v355_v23 = vadd.f32 %v354_v18, %v3071_v3 }
 0x110   :  { %v1304_v24 = vmul.f32 %v3081_v5, %v353_v16  ;;  %v1299_v25 = vmul.f32 %v3093_v11, %v464_v44  ;;  %v2626_v26 = vpack.c.bf16 %v464_v44, %v462_v52  ;;  %v1306_v27 = vmul.f32 %v3085_v7, %v466_v58 }
 0x111   :  { %v1436_v28 = vadd.f32 %v1297_v6, %v1296_v14  ;;  %2241 = vst [vmem:[#allocation2 + $0x180] sm:$0xff] %v2625_v21  ;;  %v1305_v29 = vmul.f32 %v3089_v9, %v355_v23  ;;  %v2629_v31 = vpack.c.bf16 %v355_v23, %v353_v16  ;;  %v468_v33 = vadd.f32 %v467_v19, %v3075_v4 }
 0x112   :  { %2242 = vst [vmem:[#allocation2 + $0x188] sm:$0xff] %v2626_v26  ;;  %v3280_v49 = vrot.slane %v3044_v61, %v3245_v48  ;;  %v3287_v8 = vrot.slane %v3044_v61, %v3251_v55 }
 0x113   :  { %v1437_v40 = vadd.f32 %v1436_v28, %v1298_v17  ;;  %v1445_v42 = vadd.f32 %v1305_v29, %v1304_v24  ;;  %2245 = vst [vmem:[#allocation2 + $0x1a0] sm:$0xff] %v2629_v31  ;;  %v2630_v45 = vpack.c.bf16 %v468_v33, %v466_v58  ;;  %v358_v46 = vpop.f32.mrb[28].mxu0  ;;  %v471_v47 = vpop.f32.mrb[28].mxu1  ;;  %v1307_v50 = vmul.f32 %v3093_v11, %v468_v33 }
 0x114   :  { %v359_v32 = vadd.f32 %v358_v46, %v3063_v1  ;;  %v360_v52 = vpop.f32.mrb[29].mxu0  ;;  %v472_v54 = vadd.f32 %v471_v47, %v3067_v2  ;;  %v473_v57 = vpop.f32.mrb[29].mxu1 }
 0x115   :  { %v3289_v12 = vadd.f32 %v1437_v40, %v1299_v25  ;;  %v1446_v44 = vadd.f32 %v1445_v42, %v1306_v27  ;;  %2246 = vst [vmem:[#allocation2 + $0x1a8] sm:$0xff] %v2630_v45  ;;  %v361_v13 = vadd.f32 %v360_v52, %v3071_v3  ;;  %v362_v14 = vpop.f32.mrb[30].mxu0  ;;  %v474_v16 = vadd.f32 %v473_v57, %v3075_v4  ;;  %v475_v17 = vpop.f32.mrb[30].mxu1 }
 0x116   :  { %v1312_v18 = vmul.f32 %v3081_v5, %v359_v32  ;;  %v363_v58 = vadd.f32 %v362_v14, %v3063_v1  ;;  %v1314_v19 = vmul.f32 %v3085_v7, %v472_v54  ;;  %v364_v6 = vpop.f32.mrb[31].mxu0  ;;  %v476_v61 = vadd.f32 %v475_v17, %v3067_v2  ;;  %v477_v21 = vpop.f32.mrb[31].mxu1 }
 0x117   :  { %v3297_v23 = vadd.f32 %v1446_v44, %v1307_v50  ;;  %v1313_v24 = vmul.f32 %v3089_v9, %v361_v13  ;;  %v2633_v25 = vpack.c.bf16 %v361_v13, %v359_v32  ;;  %v365_v26 = vadd.f32 %v364_v6, %v3071_v3 }
 0x118   :  { %v1320_v27 = vmul.f32 %v3081_v5, %v363_v58  ;;  %v1315_v28 = vmul.f32 %v3093_v11, %v474_v16  ;;  %v2634_v29 = vpack.c.bf16 %v474_v16, %v472_v54  ;;  %v1322_v1 = vmul.f32 %v3085_v7, %v476_v61 }
 0x119   :  { %v1454_v31 = vadd.f32 %v1313_v24, %v1312_v18  ;;  %2249 = vst [vmem:[#allocation2 + $0x1c0] sm:$0xff] %v2633_v25  ;;  %v1321_v33 = vmul.f32 %v3089_v9, %v365_v26  ;;  %v2637_v2 = vpack.c.bf16 %v365_v26, %v363_v58  ;;  %v478_v40 = vadd.f32 %v477_v21, %v3075_v4 }
 0x11a   :  { %2250 = vst [vmem:[#allocation2 + $0x1c8] sm:$0xff] %v2634_v29  ;;  %v3308_v42 = vrot.slane %v3055_v0, %v3239_v37  ;;  %v3312_v50 = vrot.slane %v3055_v0, %v3242_v39  ;;  %v3319_v44 = vrot.slane %v3055_v0, %v3245_v48 }
 0x11b   :  { %v1455_v3 = vadd.f32 %v1454_v31, %v1314_v19  ;;  %v1463_v45 = vadd.f32 %v1321_v33, %v1320_v27  ;;  %2253 = vst [vmem:[#allocation2 + $0x1e0] sm:$0xff] %v2637_v2  ;;  %v2638_v46 = vpack.c.bf16 %v478_v40, %v476_v61  ;;  %v514_v47 = vpop.f32.mrb[32].mxu0  ;;  %v627_v32 = vpop.f32.mrb[32].mxu1  ;;  %v1323_v52 = vmul.f32 %v3093_v11, %v478_v40 }
 0x11c   :  { %v515_v54 = vadd.f32 %v514_v47, %v3272_v34  ;;  %v516_v4 = vpop.f32.mrb[33].mxu0  ;;  %v628_v57 = vadd.f32 %v627_v32, %v3280_v49  ;;  %v629_v13 = vpop.f32.mrb[33].mxu1 }
 0x11d   :  { %v3321_v14 = vadd.f32 %v1455_v3, %v1315_v28  ;;  %v1464_v16 = vadd.f32 %v1463_v45, %v1322_v1  ;;  %2254 = vst [vmem:[#allocation2 + $0x1e8] sm:$0xff] %v2638_v46  ;;  %v517_v17 = vadd.f32 %v516_v4, %v3276_v36  ;;  %v518_v18 = vpop.f32.mrb[34].mxu0  ;;  %v630_v58 = vadd.f32 %v629_v13, %v3287_v8  ;;  %v631_v19 = vpop.f32.mrb[34].mxu1 }
 0x11e   :  { %v1204_v6 = vmul.f32 %v3308_v42, %v515_v54  ;;  %v519_v61 = vadd.f32 %v518_v18, %v3272_v34  ;;  %v520_v21 = vpop.f32.mrb[35].mxu0  ;;  %v632_v24 = vadd.f32 %v631_v19, %v3280_v49  ;;  %v633_v25 = vpop.f32.mrb[35].mxu1  ;;  %v1206_v33 = vmul.f32 %v3319_v44, %v628_v57 }
 0x11f   :  { %v3328_v26 = vadd.f32 %v1464_v16, %v1323_v52  ;;  %v1205_v27 = vmul.f32 %v3312_v50, %v517_v17  ;;  %v2579_v28 = vpack.c.bf16 %v517_v17, %v515_v54  ;;  %v521_v29 = vadd.f32 %v520_v21, %v3276_v36 }
 0x120   :  { %v1331_v1 = vadd.f32 %v3119_v51, %v1204_v6  ;;  %v1212_v31 = vmul.f32 %v3308_v42, %v519_v61  ;;  %v2580_v2 = vpack.c.bf16 %v630_v58, %v628_v57  ;;  %v3338_v45 = vrot.slane %v3055_v0, %v3251_v55 }
 0x121   :  { %2195 = vst [vmem:[#allocation2 + $0x10] sm:$0xff] %v2579_v28  ;;  %v1213_v40 = vmul.f32 %v3312_v50, %v521_v29  ;;  %v2583_v3 = vpack.c.bf16 %v521_v29, %v519_v61  ;;  %v634_v46 = vadd.f32 %v633_v25, %v3287_v8  ;;  %v1214_v0 = vmul.f32 %v3319_v44, %v632_v24 }
 0x122   :  { %v1340_v47 = vadd.f32 %v3127_v15, %v1212_v31  ;;  %2196 = vst [vmem:[#allocation2 + $0x18] sm:$0xff] %v2580_v2  ;;  %v1332_v32 = vadd.f32 %v1331_v1, %v1205_v27  ;;  %v1207_v21 = vmul.f32 %v3338_v45, %v630_v58 }
 0x123   :  { %2199 = vst [vmem:[#allocation2 + $0x30] sm:$0xff] %v2583_v3  ;;  %v2584_v51 = vpack.c.bf16 %v634_v46, %v632_v24  ;;  %v524_v52 = vpop.f32.mrb[36].mxu0  ;;  %v637_v54 = vpop.f32.mrb[36].mxu1  ;;  %v1215_v25 = vmul.f32 %v3338_v45, %v634_v46 }
 0x124   :  { %v1341_v4 = vadd.f32 %v1340_v47, %v1213_v40  ;;  %v525_v57 = vadd.f32 %v524_v52, %v3272_v34  ;;  %v526_v13 = vpop.f32.mrb[37].mxu0  ;;  %v638_v16 = vadd.f32 %v637_v54, %v3280_v49  ;;  %v639_v17 = vpop.f32.mrb[37].mxu1  ;;  %v1333_v18 = vadd.f32 %v1332_v32, %v1206_v33 }
 0x125   :  { %2200 = vst [vmem:[#allocation2 + $0x38] sm:$0xff] %v2584_v51  ;;  %v527_v19 = vadd.f32 %v526_v13, %v3276_v36  ;;  %v528_v15 = vpop.f32.mrb[38].mxu0  ;;  %v640_v6 = vadd.f32 %v639_v17, %v3287_v8  ;;  %v641_v61 = vpop.f32.mrb[38].mxu1 }
 0x126   :  { %v1220_v27 = vmul.f32 %v3308_v42, %v525_v57  ;;  %v529_v28 = vadd.f32 %v528_v15, %v3272_v34  ;;  %v530_v29 = vpop.f32.mrb[39].mxu0  ;;  %v642_v1 = vadd.f32 %v641_v61, %v3280_v49  ;;  %v643_v31 = vpop.f32.mrb[39].mxu1  ;;  %v1222_v46 = vmul.f32 %v3319_v44, %v638_v16 }
 0x127   :  { %v1221_v24 = vmul.f32 %v3312_v50, %v527_v19  ;;  %v2587_v33 = vpack.c.bf16 %v527_v19, %v525_v57  ;;  %v531_v2 = vadd.f32 %v530_v29, %v3276_v36  ;;  %v2588_v40 = vpack.c.bf16 %v640_v6, %v638_v16 }
 0x128   :  { %v1349_v3 = vadd.f32 %v3145_v35, %v1220_v27  ;;  %v1228_v58 = vmul.f32 %v3308_v42, %v529_v28  ;;  %v644_v47 = vadd.f32 %v643_v31, %v3287_v8  ;;  %v1334_v52 = vadd.f32 %v1333_v18, %v1207_v21 }
 0x129   :  { %2203 = vst [vmem:[#allocation2 + $0x50] sm:$0xff] %v2587_v33  ;;  %v1229_v32 = vmul.f32 %v3312_v50, %v531_v2  ;;  %v2591_v51 = vpack.c.bf16 %v531_v2, %v529_v28  ;;  %2204 = vst [vmem:[#allocation2 + $0x58] sm:$0xff] %v2588_v40  ;;  %v1342_v54 = vadd.f32 %v1341_v4, %v1214_v0 }
 0x12a   :  { %v1358_v57 = vadd.f32 %v3153_v53, %v1228_v58  ;;  %v2592_v13 = vpack.c.bf16 %v644_v47, %v642_v1  ;;  %1335 = vadd.xlane.f32.xlu0 %v1334_v52  ;;  %v1350_v15 = vadd.f32 %v1349_v3, %v1221_v24  ;;  %v1230_v31 = vmul.f32 %v3319_v44, %v642_v1 }
 0x12b   :  { %2207 = vst [vmem:[#allocation2 + $0x70] sm:$0xff] %v2591_v51  ;;  %v534_v17 = vpop.f32.mrb[40].mxu0  ;;  %v1343_v35 = vadd.f32 %v1342_v54, %v1215_v25  ;;  %v647_v19 = vpop.f32.mrb[40].mxu1  ;;  %v1223_v40 = vmul.f32 %v3338_v45, %v640_v6 }
 0x12c   :  { %v1359_v61 = vadd.f32 %v1358_v57, %v1229_v32  ;;  %2208 = vst [vmem:[#allocation2 + $0x78] sm:$0xff] %v2592_v13  ;;  %v535_v16 = vadd.f32 %v534_v17, %v3272_v34  ;;  %v536_v27 = vpop.f32.mrb[41].mxu0  ;;  %v648_v29 = vadd.f32 %v647_v19, %v3280_v49  ;;  %v649_v28 = vpop.f32.mrb[41].mxu1  ;;  %v1351_v21 = vadd.f32 %v1350_v15, %v1222_v46 }
 0x12d   :  { %v537_v18 = vadd.f32 %v536_v27, %v3276_v36  ;;  %v538_v4 = vpop.f32.mrb[42].mxu0  ;;  %v650_v53 = vadd.f32 %v649_v28, %v3287_v8  ;;  %v651_v0 = vpop.f32.mrb[42].mxu1 }
 0x12e   :  { %v1236_v25 = vmul.f32 %v3308_v42, %v535_v16  ;;  %v539_v24 = vadd.f32 %v538_v4, %v3272_v34  ;;  %v540_v33 = vpop.f32.mrb[43].mxu0  ;;  %v653_v2 = vpop.f32.mrb[43].mxu1  ;;  %1344 = vadd.xlane.f32.xlu0 %v1343_v35  ;;  %v652_v51 = vadd.f32 %v651_v0, %v3280_v49  ;;  %v1238_v52 = vmul.f32 %v3319_v44, %v648_v29 }
 0x12f   :  { %v1237_v3 = vmul.f32 %v3312_v50, %v537_v18  ;;  %v2595_v58 = vpack.c.bf16 %v537_v18, %v535_v16  ;;  %v541_v32 = vadd.f32 %v540_v33, %v3276_v36  ;;  %v2596_v54 = vpack.c.bf16 %v650_v53, %v648_v29 }
 0x130   :  { %v1367_v46 = vadd.f32 %v3171_v38, %v1236_v25  ;;  %v1244_v1 = vmul.f32 %v3308_v42, %v539_v24  ;;  %v654_v6 = vadd.f32 %v653_v2, %v3287_v8  ;;  %v1352_v17 = vadd.f32 %v1351_v21, %v1223_v40 }
 0x131   :  { %2211 = vst [vmem:[#allocation2 + $0x90] sm:$0xff] %v2595_v58  ;;  %v1245_v57 = vmul.f32 %v3312_v50, %v541_v32  ;;  %v2599_v13 = vpack.c.bf16 %v541_v32, %v539_v24  ;;  %v1231_v35 = vmul.f32 %v3338_v45, %v644_v47  ;;  %2212 = vst [vmem:[#allocation2 + $0x98] sm:$0xff] %v2596_v54 }
 0x132   :  { %v1368_v19 = vadd.f32 %v1367_v46, %v1237_v3  ;;  %v1376_v15 = vadd.f32 %v3179_v43, %v1244_v1  ;;  %v1360_v16 = vadd.f32 %v1359_v61, %v1230_v31  ;;  %v2600_v38 = vpack.c.bf16 %v654_v6, %v652_v51  ;;  %1353 = vadd.xlane.f32.xlu1 %v1352_v17 }
 0x133   :  { %2215 = vst [vmem:[#allocation2 + $0xb0] sm:$0xff] %v2599_v13  ;;  %v544_v27 = vpop.f32.mrb[44].mxu0  ;;  %v657_v28 = vpop.f32.mrb[44].mxu1  ;;  %v1239_v33 = vmul.f32 %v3338_v45, %v650_v53  ;;  %v1246_v2 = vmul.f32 %v3319_v44, %v652_v51 }
 0x134   :  { %v1377_v29 = vadd.f32 %v1376_v15, %v1245_v57  ;;  %v545_v18 = vadd.f32 %v544_v27, %v3272_v34  ;;  %v546_v4 = vpop.f32.mrb[45].mxu0  ;;  %v1361_v0 = vadd.f32 %v1360_v16, %v1231_v35  ;;  %v658_v25 = vadd.f32 %v657_v28, %v3280_v49  ;;  %v659_v21 = vpop.f32.mrb[45].mxu1  ;;  %2216 = vst [vmem:[#allocation2 + $0xb8] sm:$0xff] %v2600_v38 }
 0x135   :  { %v547_v47 = vadd.f32 %v546_v4, %v3276_v36  ;;  %v548_v24 = vpop.f32.mrb[46].mxu0  ;;  %v660_v43 = vadd.f32 %v659_v21, %v3287_v8  ;;  %v661_v61 = vpop.f32.mrb[46].mxu1  ;;  %v1369_v31 = vadd.f32 %v1368_v19, %v1238_v52  ;;  %v1247_v16 = vmul.f32 %v3338_v45, %v654_v6 }
 0x136   :  { %v1252_v40 = vmul.f32 %v3308_v42, %v545_v18  ;;  %v549_v3 = vadd.f32 %v548_v24, %v3272_v34  ;;  %v550_v58 = vpop.f32.mrb[47].mxu0  ;;  %v663_v32 = vpop.f32.mrb[47].mxu1  ;;  %1362 = vadd.xlane.f32.xlu1 %v1361_v0  ;;  %v662_v57 = vadd.f32 %v661_v61, %v3280_v49  ;;  %v1254_v51 = vmul.f32 %v3319_v44, %v658_v25 }
 0x137   :  { %v1253_v46 = vmul.f32 %v3312_v50, %v547_v47  ;;  %v2603_v1 = vpack.c.bf16 %v547_v47, %v545_v18  ;;  %v551_v54 = vadd.f32 %v550_v58, %v3276_v36  ;;  %v2604_v13 = vpack.c.bf16 %v660_v43, %v658_v25 }
 0x138   :  { %v1385_v52 = vadd.f32 %v3197_v41, %v1252_v40  ;;  %v1260_v53 = vmul.f32 %v3308_v42, %v549_v3  ;;  %v664_v19 = vadd.f32 %v663_v32, %v3287_v8  ;;  %v1370_v15 = vadd.f32 %v1369_v31, %v1239_v33 }
 0x139   :  { %2219 = vst [vmem:[#allocation2 + $0xd0] sm:$0xff] %v2603_v1  ;;  %v1261_v17 = vmul.f32 %v3312_v50, %v551_v54  ;;  %v2607_v35 = vpack.c.bf16 %v551_v54, %v549_v3  ;;  %2220 = vst [vmem:[#allocation2 + $0xd8] sm:$0xff] %v2604_v13  ;;  %v1378_v28 = vadd.f32 %v1377_v29, %v1246_v2 }
 0x13a   :  { %v1386_v38 = vadd.f32 %v1385_v52, %v1253_v46  ;;  %v1394_v27 = vadd.f32 %v3205_v30, %v1260_v53  ;;  %v2608_v41 = vpack.c.bf16 %v664_v19, %v662_v57  ;;  %1371 = vadd.xlane.f32.xlu0 %v1370_v15  ;;  %v1255_v2 = vmul.f32 %v3338_v45, %v660_v43 }
 0x13b   :  { %2223 = vst [vmem:[#allocation2 + $0xf0] sm:$0xff] %v2607_v35  ;;  %v554_v18 = vpop.f32.mrb[48].mxu0  ;;  %v667_v4 = vpop.f32.mrb[48].mxu1  ;;  %v1379_v25 = vadd.f32 %v1378_v28, %v1247_v16  ;;  %v1262_v40 = vmul.f32 %v3319_v44, %v662_v57 }
 0x13c   :  { %v1395_v0 = vadd.f32 %v1394_v27, %v1261_v17  ;;  %v555_v21 = vadd.f32 %v554_v18, %v3272_v34  ;;  %v556_v47 = vpop.f32.mrb[49].mxu0  ;;  %v668_v24 = vadd.f32 %v667_v4, %v3280_v49  ;;  %v669_v61 = vpop.f32.mrb[49].mxu1  ;;  %2224 = vst [vmem:[#allocation2 + $0xf8] sm:$0xff] %v2608_v41  ;;  %v1387_v33 = vadd.f32 %v1386_v38, %v1254_v51 }
 0x13d   :  { %v557_v6 = vadd.f32 %v556_v47, %v3276_v36  ;;  %v558_v31 = vpop.f32.mrb[50].mxu0  ;;  %v670_v30 = vadd.f32 %v669_v61, %v3287_v8  ;;  %v671_v29 = vpop.f32.mrb[50].mxu1  ;;  %1380 = vadd.xlane.f32.xlu1 %v1379_v25  ;;  %v1263_v38 = vmul.f32 %v3338_v45, %v664_v19 }
 0x13e   :  { %v1268_v3 = vmul.f32 %v3308_v42, %v555_v21  ;;  %v559_v58 = vadd.f32 %v558_v31, %v3272_v34  ;;  %v560_v32 = vpop.f32.mrb[51].mxu0  ;;  %v673_v46 = vpop.f32.mrb[51].mxu1  ;;  %v672_v53 = vadd.f32 %v671_v29, %v3280_v49  ;;  %v1270_v57 = vmul.f32 %v3319_v44, %v668_v24 }
 0x13f   :  { %v1269_v1 = vmul.f32 %v3312_v50, %v557_v6  ;;  %v2611_v54 = vpack.c.bf16 %v557_v6, %v555_v21  ;;  %v561_v52 = vadd.f32 %v560_v32, %v3276_v36  ;;  %v2612_v13 = vpack.c.bf16 %v670_v30, %v668_v24 }
 0x140   :  { %v1403_v51 = vadd.f32 %v3221_v10, %v1268_v3  ;;  %v1276_v43 = vmul.f32 %v3308_v42, %v559_v58  ;;  %v674_v15 = vadd.f32 %v673_v46, %v3287_v8  ;;  %v1388_v16 = vadd.f32 %v1387_v33, %v1255_v2 }
 0x141   :  { %2227 = vst [vmem:[#allocation2 + $0x110] sm:$0xff] %v2611_v54  ;;  %v1277_v17 = vmul.f32 %v3312_v50, %v561_v52  ;;  %v2615_v35 = vpack.c.bf16 %v561_v52, %v559_v58  ;;  %2228 = vst [vmem:[#allocation2 + $0x118] sm:$0xff] %v2612_v13  ;;  %v1396_v41 = vadd.f32 %v1395_v0, %v1262_v40 }
 0x142   :  { %v1404_v27 = vadd.f32 %v1403_v51, %v1269_v1  ;;  %v1412_v28 = vadd.f32 %v3229_v22, %v1276_v43  ;;  %v2616_v10 = vpack.c.bf16 %v674_v15, %v672_v53  ;;  %1389 = vadd.xlane.f32.xlu0 %v1388_v16  ;;  %v1271_v33 = vmul.f32 %v3338_v45, %v670_v30 }
 0x143   :  { %2231 = vst [vmem:[#allocation2 + $0x130] sm:$0xff] %v2615_v35  ;;  %v564_v18 = vpop.f32.mrb[52].mxu0  ;;  %v677_v4 = vpop.f32.mrb[52].mxu1  ;;  %v1397_v21 = vadd.f32 %v1396_v41, %v1263_v38  ;;  %v1278_v2 = vmul.f32 %v3319_v44, %v672_v53  ;;  %v1279_v16 = vmul.f32 %v3338_v45, %v674_v15 }
 0x144   :  { %v1413_v25 = vadd.f32 %v1412_v28, %v1277_v17  ;;  %v565_v47 = vadd.f32 %v564_v18, %v3272_v34  ;;  %v566_v24 = vpop.f32.mrb[53].mxu0  ;;  %v678_v61 = vadd.f32 %v677_v4, %v3280_v49  ;;  %v679_v6 = vpop.f32.mrb[53].mxu1  ;;  %2232 = vst [vmem:[#allocation2 + $0x138] sm:$0xff] %v2616_v10  ;;  %v1405_v29 = vadd.f32 %v1404_v27, %v1270_v57 }
 0x145   :  { %v567_v19 = vadd.f32 %v566_v24, %v3276_v36  ;;  %v568_v31 = vpop.f32.mrb[54].mxu0  ;;  %v680_v22 = vadd.f32 %v679_v6, %v3287_v8  ;;  %v681_v0 = vpop.f32.mrb[54].mxu1  ;;  %1398 = vadd.xlane.f32.xlu1 %v1397_v21 }
 0x146   :  { %v1284_v40 = vmul.f32 %v3308_v42, %v565_v47  ;;  %v569_v3 = vadd.f32 %v568_v31, %v3272_v34  ;;  %v570_v58 = vpop.f32.mrb[55].mxu0  ;;  %v683_v32 = vpop.f32.mrb[55].mxu1  ;;  %v682_v52 = vadd.f32 %v681_v0, %v3280_v49  ;;  %v1286_v53 = vmul.f32 %v3319_v44, %v678_v61 }
 0x147   :  { %v1285_v46 = vmul.f32 %v3312_v50, %v567_v19  ;;  %v2619_v1 = vpack.c.bf16 %v567_v19, %v565_v47  ;;  %v571_v54 = vadd.f32 %v570_v58, %v3276_v36  ;;  %v2620_v43 = vpack.c.bf16 %v680_v22, %v678_v61 }
 0x148   :  { %v1421_v51 = vadd.f32 %v3253_v56, %v1284_v40  ;;  %v1292_v30 = vmul.f32 %v3308_v42, %v569_v3  ;;  %v684_v17 = vadd.f32 %v683_v32, %v3287_v8  ;;  %v1406_v35 = vadd.f32 %v1405_v29, %v1271_v33 }
 0x149   :  { %2235 = vst [vmem:[#allocation2 + $0x150] sm:$0xff] %v2619_v1  ;;  %v1293_v57 = vmul.f32 %v3312_v50, %v571_v54  ;;  %v2623_v13 = vpack.c.bf16 %v571_v54, %v569_v3  ;;  %2236 = vst [vmem:[#allocation2 + $0x158] sm:$0xff] %v2620_v43  ;;  %v1414_v28 = vadd.f32 %v1413_v25, %v1278_v2 }
 0x14a   :  { %v1422_v38 = vadd.f32 %v1421_v51, %v1285_v46  ;;  %v1430_v27 = vadd.f32 %v3261_v20, %v1292_v30  ;;  %v2624_v56 = vpack.c.bf16 %v684_v17, %v682_v52  ;;  %1407 = vadd.xlane.f32.xlu0 %v1406_v35  ;;  %v1287_v31 = vmul.f32 %v3338_v45, %v680_v22  ;;  %v3449_v51 = vld [vmem:[%s3966_s2 + $0x8] sm:$0xff] }
 0x14b   :  { %2239 = vst [vmem:[#allocation2 + $0x170] sm:$0xff] %v2623_v13  ;;  %v574_v41 = vpop.f32.mrb[56].mxu0  ;;  %v687_v10 = vpop.f32.mrb[56].mxu1  ;;  %v1415_v4 = vadd.f32 %v1414_v28, %v1279_v16  ;;  %v1294_v0 = vmul.f32 %v3319_v44, %v682_v52  ;;  %v1295_v13 = vmul.f32 %v3338_v45, %v684_v17  ;;  %v3465_v17 = vrot.slane %v3449_v51, %v3039_v60 }
 0x14c   :  { %v1431_v18 = vadd.f32 %v1430_v27, %v1293_v57  ;;  %v575_v21 = vadd.f32 %v574_v41, %v3272_v34  ;;  %v576_v47 = vpop.f32.mrb[57].mxu0  ;;  %v688_v24 = vadd.f32 %v687_v10, %v3280_v49  ;;  %v689_v61 = vpop.f32.mrb[57].mxu1  ;;  %2240 = vst [vmem:[#allocation2 + $0x178] sm:$0xff] %v2624_v56  ;;  %v1423_v19 = vadd.f32 %v1422_v38, %v1286_v53 }
 0x14d   :  { %v577_v15 = vadd.f32 %v576_v47, %v3276_v36  ;;  %v578_v6 = vpop.f32.mrb[58].mxu0  ;;  %v690_v20 = vadd.f32 %v689_v61, %v3287_v8  ;;  %v691_v25 = vpop.f32.mrb[58].mxu1  ;;  %1416 = vadd.xlane.f32.xlu1 %v1415_v4  ;;  %v3457_v56 = vrot.slane %v3449_v51, %v3036_v59  ;;  %v3461_v41 = vrot.slane %v3449_v51, %v3047_v62 }
 0x14e   :  { %v1300_v29 = vmul.f32 %v3308_v42, %v575_v21  ;;  %v579_v33 = vadd.f32 %v578_v6, %v3272_v34  ;;  %v580_v2 = vpop.f32.mrb[59].mxu0  ;;  %v693_v40 = vpop.f32.mrb[59].mxu1  ;;  %v692_v46 = vadd.f32 %v691_v25, %v3280_v49  ;;  %v1302_v54 = vmul.f32 %v3319_v44, %v688_v24 }
 0x14f   :  { %v1301_v3 = vmul.f32 %v3312_v50, %v577_v15  ;;  %v2627_v58 = vpack.c.bf16 %v577_v15, %v575_v21  ;;  %v581_v32 = vadd.f32 %v580_v2, %v3276_v36  ;;  %v2628_v52 = vpack.c.bf16 %v690_v20, %v688_v24 }
 0x150   :  { %v1439_v1 = vadd.f32 %v3289_v12, %v1300_v29  ;;  %v1308_v22 = vmul.f32 %v3308_v42, %v579_v33  ;;  %v694_v43 = vadd.f32 %v693_v40, %v3287_v8  ;;  %v1424_v57 = vadd.f32 %v1423_v19, %v1287_v31 }
 0x151   :  { %2243 = vst [vmem:[#allocation2 + $0x190] sm:$0xff] %v2627_v58  ;;  %v1309_v30 = vmul.f32 %v3312_v50, %v581_v32  ;;  %v2631_v53 = vpack.c.bf16 %v581_v32, %v579_v33  ;;  %2244 = vst [vmem:[#allocation2 + $0x198] sm:$0xff] %v2628_v52  ;;  %v1432_v16 = vadd.f32 %v1431_v18, %v1294_v0 }
 0x152   :  { %v1440_v12 = vadd.f32 %v1439_v1, %v1301_v3  ;;  %v1448_v35 = vadd.f32 %v3297_v23, %v1308_v22  ;;  %v2632_v38 = vpack.c.bf16 %v694_v43, %v692_v46  ;;  %1425 = vadd.xlane.f32.xlu0 %v1424_v57  ;;  %v3473_v60 = vrot.slane %v3449_v51, %v3050_v63 }
 0x153   :  { %2247 = vst [vmem:[#allocation2 + $0x1b0] sm:$0xff] %v2631_v53  ;;  %v584_v27 = vpop.f32.mrb[60].mxu0  ;;  %v697_v28 = vpop.f32.mrb[60].mxu1  ;;  %v1433_v10 = vadd.f32 %v1432_v16, %v1295_v13  ;;  %v1303_v6 = vmul.f32 %v3338_v45, %v690_v20  ;;  %v1310_v25 = vmul.f32 %v3319_v44, %v692_v46 }
 0x154   :  { %v1449_v23 = vadd.f32 %v1448_v35, %v1309_v30  ;;  %v585_v18 = vadd.f32 %v584_v27, %v3272_v34  ;;  %v586_v4 = vpop.f32.mrb[61].mxu0  ;;  %v698_v21 = vadd.f32 %v697_v28, %v3280_v49  ;;  %v699_v47 = vpop.f32.mrb[61].mxu1  ;;  %2248 = vst [vmem:[#allocation2 + $0x1b8] sm:$0xff] %v2632_v38  ;;  %v1441_v15 = vadd.f32 %v1440_v12, %v1302_v54 }
 0x155   :  { %v587_v59 = vadd.f32 %v586_v4, %v3276_v36  ;;  %v588_v24 = vpop.f32.mrb[62].mxu0  ;;  %v700_v61 = vadd.f32 %v699_v47, %v3287_v8  ;;  %v701_v62 = vpop.f32.mrb[62].mxu1  ;;  %1434 = vadd.xlane.f32.xlu1 %v1433_v10  ;;  %v1311_v54 = vmul.f32 %v3338_v45, %v694_v43 }
 0x156   :  { %v1316_v19 = vmul.f32 %v3308_v42, %v585_v18  ;;  %v589_v31 = vadd.f32 %v588_v24, %v3272_v34  ;;  %v590_v0 = vpop.f32.mrb[63].mxu0  ;;  %v703_v29 = vpop.f32.mrb[63].mxu1  ;;  %v702_v3 = vadd.f32 %v701_v62, %v3280_v49  ;;  %v1318_v58 = vmul.f32 %v3319_v44, %v698_v21 }
 0x157   :  { %v1317_v33 = vmul.f32 %v3312_v50, %v587_v59  ;;  %v2635_v2 = vpack.c.bf16 %v587_v59, %v585_v18  ;;  %v591_v40 = vadd.f32 %v590_v0, %v3276_v36  ;;  %v2636_v32 = vpack.c.bf16 %v700_v61, %v698_v21 }
 0x158   :  { %v1457_v63 = vadd.f32 %v3321_v14, %v1316_v19  ;;  %v1324_v20 = vmul.f32 %v3308_v42, %v589_v31  ;;  %v704_v1 = vadd.f32 %v703_v29, %v3287_v8  ;;  %v1442_v22 = vadd.f32 %v1441_v15, %v1303_v6 }
 0x159   :  { %2251 = vst [vmem:[#allocation2 + $0x1d0] sm:$0xff] %v2635_v2  ;;  %v1325_v46 = vmul.f32 %v3312_v50, %v591_v40  ;;  %v2639_v34 = vpack.c.bf16 %v591_v40, %v589_v31  ;;  %2252 = vst [vmem:[#allocation2 + $0x1d8] sm:$0xff] %v2636_v32  ;;  %v1450_v49 = vadd.f32 %v1449_v23, %v1310_v25 }
 0x15a   :  { %v1458_v52 = vadd.f32 %v1457_v63, %v1317_v33  ;;  %v1466_v36 = vadd.f32 %v3328_v26, %v1324_v20  ;;  %v2640_v14 = vpack.c.bf16 %v704_v1, %v702_v3  ;;  %1443 = vadd.xlane.f32.xlu0 %v1442_v22  ;;  %v1319_v43 = vmul.f32 %v3338_v45, %v700_v61 }
 0x15b   :  { %2255 = vst [vmem:[#allocation2 + $0x1f0] sm:$0xff] %v2639_v34  ;;  %v740_v30 = vpop.f32.mrb[64].mxu0  ;;  %v853_v53 = vpop.f32.mrb[64].mxu1  ;;  %v1451_v13 = vadd.f32 %v1450_v49, %v1311_v54  ;;  %v1326_v10 = vmul.f32 %v3319_v44, %v702_v3  ;;  %v1327_v6 = vmul.f32 %v3338_v45, %v704_v1 }
 0x15c   :  { %v1467_v57 = vadd.f32 %v1466_v36, %v1325_v46  ;;  %v741_v12 = vadd.f32 %v740_v30, %v3457_v56  ;;  %v742_v35 = vpop.f32.mrb[65].mxu0  ;;  %v854_v8 = vadd.f32 %v853_v53, %v3465_v17  ;;  %v855_v16 = vpop.f32.mrb[65].mxu1  ;;  %2256 = vst [vmem:[#allocation2 + $0x1f8] sm:$0xff] %v2640_v14  ;;  %v1459_v23 = vadd.f32 %v1458_v52, %v1318_v58 }
 0x15d   :  { %v743_v26 = vadd.f32 %v742_v35, %v3461_v41  ;;  %v744_v38 = vpop.f32.mrb[66].mxu0  ;;  %v856_v27 = vadd.f32 %v855_v16, %v3473_v60  ;;  %v857_v28 = vpop.f32.mrb[66].mxu1  ;;  %1452 = vadd.xlane.f32.xlu1 %v1451_v13 }
 0x15e   :  { %v1505_v18 = vmul.f32 %v3081_v5, %v741_v12  ;;  %2257 = vst [vmem:[#allocation4] sm:$0xff] %v741_v12  ;;  %v745_v4 = vadd.f32 %v744_v38, %v3457_v56  ;;  %2259 = vst [vmem:[#allocation4 + $0x10] sm:$0xff] %v854_v8  ;;  %v746_v21 = vpop.f32.mrb[67].mxu0  ;;  %v858_v47 = vadd.f32 %v857_v28, %v3465_v17  ;;  %v859_v59 = vpop.f32.mrb[67].mxu1 }
 0x15f   :  { %v1506_v24 = vmul.f32 %v3089_v9, %v743_v26  ;;  %2258 = vst [vmem:[#allocation4 + $0x8] sm:$0xff] %v743_v26  ;;  %v1507_v61 = vmul.f32 %v3085_v7, %v854_v8  ;;  %v747_v62 = vadd.f32 %v746_v21, %v3461_v41  ;;  %2260 = vst [vmem:[#allocation4 + $0x18] sm:$0xff] %v856_v27 }
 0x160   :  { %v860_v15 = vadd.f32 %v859_v59, %v3473_v60  ;;  %v1513_v25 = vmul.f32 %v3081_v5, %v745_v4  ;;  %2265 = vst [vmem:[#allocation4 + $0x40] sm:$0xff] %v745_v4  ;;  %2267 = vst [vmem:[#allocation4 + $0x50] sm:$0xff] %v858_v47  ;;  %v1460_v19 = vadd.f32 %v1459_v23, %v1319_v43 }
 0x161   :  { %v1468_v31 = vadd.f32 %v1467_v57, %v1326_v10  ;;  %v1633_v0 = vadd.f32 %v1506_v24, %v1505_v18  ;;  %v1514_v29 = vmul.f32 %v3089_v9, %v747_v62  ;;  %2266 = vst [vmem:[#allocation4 + $0x48] sm:$0xff] %v747_v62  ;;  %v1508_v33 = vmul.f32 %v3093_v11, %v856_v27 }
 0x162   :  { %v1515_v2 = vmul.f32 %v3085_v7, %v858_v47  ;;  %2268 = vst [vmem:[#allocation4 + $0x58] sm:$0xff] %v860_v15  ;;  %1461 = vadd.xlane.f32.xlu0 %v1460_v19  ;;  %v1516_v32 = vmul.f32 %v3093_v11, %v860_v15 }
 0x163   :  { %v1469_v40 = vadd.f32 %v1468_v31, %v1327_v6  ;;  %v1634_v3 = vadd.f32 %v1633_v0, %v1507_v61  ;;  %v1642_v63 = vadd.f32 %v1514_v29, %v1513_v25  ;;  %v750_v20 = vpop.f32.mrb[68].mxu0  ;;  %v863_v58 = vpop.f32.mrb[68].mxu1 }
 0x164   :  { %v751_v46 = vadd.f32 %v750_v20, %v3457_v56  ;;  %v752_v34 = vpop.f32.mrb[69].mxu0  ;;  %v864_v1 = vadd.f32 %v863_v58, %v3465_v17  ;;  %v865_v22 = vpop.f32.mrb[69].mxu1 }
 0x165   :  { %1470 = vadd.xlane.f32.xlu1 %v1469_v40  ;;  %v3510_v54 = vadd.f32 %v1634_v3, %v1508_v33  ;;  %v1643_v52 = vadd.f32 %v1642_v63, %v1515_v2  ;;  %v753_v36 = vadd.f32 %v752_v34, %v3461_v41  ;;  %v754_v49 = vpop.f32.mrb[70].mxu0  ;;  %v866_v14 = vadd.f32 %v865_v22, %v3473_v60  ;;  %v867_v30 = vpop.f32.mrb[70].mxu1 }
 0x166   :  { %v1521_v53 = vmul.f32 %v3081_v5, %v751_v46  ;;  %2273 = vst [vmem:[#allocation4 + $0x80] sm:$0xff] %v751_v46  ;;  %v755_v57 = vadd.f32 %v754_v49, %v3457_v56  ;;  %2275 = vst [vmem:[#allocation4 + $0x90] sm:$0xff] %v864_v1  ;;  %v756_v13 = vpop.f32.mrb[71].mxu0  ;;  %v868_v12 = vadd.f32 %v867_v30, %v3465_v17  ;;  %v869_v35 = vpop.f32.mrb[71].mxu1 }
 0x167   :  { %v3517_v8 = vadd.f32 %v1643_v52, %v1516_v32  ;;  %v1522_v16 = vmul.f32 %v3089_v9, %v753_v36  ;;  %2274 = vst [vmem:[#allocation4 + $0x88] sm:$0xff] %v753_v36  ;;  %v1523_v43 = vmul.f32 %v3085_v7, %v864_v1  ;;  %v757_v26 = vadd.f32 %v756_v13, %v3461_v41 }
 0x168   :  { %2276 = vst [vmem:[#allocation4 + $0x98] sm:$0xff] %v866_v14  ;;  %v1529_v38 = vmul.f32 %v3081_v5, %v755_v57  ;;  %2281 = vst [vmem:[#allocation4 + $0xc0] sm:$0xff] %v755_v57  ;;  %v870_v27 = vadd.f32 %v869_v35, %v3473_v60  ;;  %v1524_v10 = vmul.f32 %v3093_v11, %v866_v14 }
 0x169   :  { %2283 = vst [vmem:[#allocation4 + $0xd0] sm:$0xff] %v868_v12  ;;  %v1651_v28 = vadd.f32 %v1522_v16, %v1521_v53  ;;  %v1530_v23 = vmul.f32 %v3089_v9, %v757_v26  ;;  %2282 = vst [vmem:[#allocation4 + $0xc8] sm:$0xff] %v757_v26  ;;  %v1531_v18 = vmul.f32 %v3085_v7, %v868_v12 }
 0x16a   :  { %2284 = vst [vmem:[#allocation4 + $0xd8] sm:$0xff] %v870_v27  ;;  %v1532_v24 = vmul.f32 %v3093_v11, %v870_v27 }
 0x16b   :  { %v1652_v4 = vadd.f32 %v1651_v28, %v1523_v43  ;;  %v1660_v21 = vadd.f32 %v1530_v23, %v1529_v38  ;;  %v760_v47 = vpop.f32.mrb[72].mxu0  ;;  %v873_v59 = vpop.f32.mrb[72].mxu1 }
 0x16c   :  { %v761_v61 = vadd.f32 %v760_v47, %v3457_v56  ;;  %v762_v62 = vpop.f32.mrb[73].mxu0  ;;  %v874_v15 = vadd.f32 %v873_v59, %v3465_v17  ;;  %v875_v6 = vpop.f32.mrb[73].mxu1 }
 0x16d   :  { %v3530_v25 = vadd.f32 %v1652_v4, %v1524_v10  ;;  %v1661_v19 = vadd.f32 %v1660_v21, %v1531_v18  ;;  %v763_v31 = vadd.f32 %v762_v62, %v3461_v41  ;;  %v764_v0 = vpop.f32.mrb[74].mxu0  ;;  %v876_v29 = vadd.f32 %v875_v6, %v3473_v60  ;;  %v877_v33 = vpop.f32.mrb[74].mxu1 }
 0x16e   :  { %v1537_v2 = vmul.f32 %v3081_v5, %v761_v61  ;;  %2289 = vst [vmem:[#allocation4 + $0x100] sm:$0xff] %v761_v61  ;;  %v765_v40 = vadd.f32 %v764_v0, %v3457_v56  ;;  %2291 = vst [vmem:[#allocation4 + $0x110] sm:$0xff] %v874_v15  ;;  %v766_v3 = vpop.f32.mrb[75].mxu0  ;;  %v878_v63 = vadd.f32 %v877_v33, %v3465_v17  ;;  %v879_v20 = vpop.f32.mrb[75].mxu1 }
 0x16f   :  { %v3537_v58 = vadd.f32 %v1661_v19, %v1532_v24  ;;  %v1538_v32 = vmul.f32 %v3089_v9, %v763_v31  ;;  %2290 = vst [vmem:[#allocation4 + $0x108] sm:$0xff] %v763_v31  ;;  %v1539_v46 = vmul.f32 %v3085_v7, %v874_v15  ;;  %v767_v34 = vadd.f32 %v766_v3, %v3461_v41 }
 0x170   :  { %2292 = vst [vmem:[#allocation4 + $0x118] sm:$0xff] %v876_v29  ;;  %v1545_v1 = vmul.f32 %v3081_v5, %v765_v40  ;;  %2297 = vst [vmem:[#allocation4 + $0x140] sm:$0xff] %v765_v40  ;;  %v880_v22 = vadd.f32 %v879_v20, %v3473_v60  ;;  %v1540_v49 = vmul.f32 %v3093_v11, %v876_v29 }
 0x171   :  { %2299 = vst [vmem:[#allocation4 + $0x150] sm:$0xff] %v878_v63  ;;  %v1669_v52 = vadd.f32 %v1538_v32, %v1537_v2  ;;  %v1546_v36 = vmul.f32 %v3089_v9, %v767_v34  ;;  %2298 = vst [vmem:[#allocation4 + $0x148] sm:$0xff] %v767_v34  ;;  %v1547_v14 = vmul.f32 %v3085_v7, %v878_v63 }
 0x172   :  { %2300 = vst [vmem:[#allocation4 + $0x158] sm:$0xff] %v880_v22  ;;  %v1548_v12 = vmul.f32 %v3093_v11, %v880_v22 }
 0x173   :  { %v1670_v30 = vadd.f32 %v1669_v52, %v1539_v46  ;;  %v1678_v53 = vadd.f32 %v1546_v36, %v1545_v1  ;;  %v770_v57 = vpop.f32.mrb[76].mxu0  ;;  %v883_v13 = vpop.f32.mrb[76].mxu1 }
 0x174   :  { %v771_v35 = vadd.f32 %v770_v57, %v3457_v56  ;;  %v772_v16 = vpop.f32.mrb[77].mxu0  ;;  %v884_v43 = vadd.f32 %v883_v13, %v3465_v17  ;;  %v885_v26 = vpop.f32.mrb[77].mxu1 }
 0x175   :  { %v3550_v38 = vadd.f32 %v1670_v30, %v1540_v49  ;;  %v1679_v27 = vadd.f32 %v1678_v53, %v1547_v14  ;;  %v773_v28 = vadd.f32 %v772_v16, %v3461_v41  ;;  %v774_v23 = vpop.f32.mrb[78].mxu0  ;;  %v886_v10 = vadd.f32 %v885_v26, %v3473_v60  ;;  %v887_v18 = vpop.f32.mrb[78].mxu1 }
 0x176   :  { %v1553_v4 = vmul.f32 %v3081_v5, %v771_v35  ;;  %2305 = vst [vmem:[#allocation4 + $0x180] sm:$0xff] %v771_v35  ;;  %v775_v21 = vadd.f32 %v774_v23, %v3457_v56  ;;  %2307 = vst [vmem:[#allocation4 + $0x190] sm:$0xff] %v884_v43  ;;  %v776_v47 = vpop.f32.mrb[79].mxu0  ;;  %v888_v59 = vadd.f32 %v887_v18, %v3465_v17  ;;  %v889_v24 = vpop.f32.mrb[79].mxu1 }
 0x177   :  { %v3557_v61 = vadd.f32 %v1679_v27, %v1548_v12  ;;  %v1554_v62 = vmul.f32 %v3089_v9, %v773_v28  ;;  %2306 = vst [vmem:[#allocation4 + $0x188] sm:$0xff] %v773_v28  ;;  %v1555_v15 = vmul.f32 %v3085_v7, %v884_v43  ;;  %v777_v6 = vadd.f32 %v776_v47, %v3461_v41 }
 0x178   :  { %2308 = vst [vmem:[#allocation4 + $0x198] sm:$0xff] %v886_v10  ;;  %v1561_v19 = vmul.f32 %v3081_v5, %v775_v21  ;;  %2313 = vst [vmem:[#allocation4 + $0x1c0] sm:$0xff] %v775_v21  ;;  %v890_v31 = vadd.f32 %v889_v24, %v3473_v60  ;;  %v1556_v33 = vmul.f32 %v3093_v11, %v886_v10 }
 0x179   :  { %2315 = vst [vmem:[#allocation4 + $0x1d0] sm:$0xff] %v888_v59  ;;  %v1687_v0 = vadd.f32 %v1554_v62, %v1553_v4  ;;  %v1562_v29 = vmul.f32 %v3089_v9, %v777_v6  ;;  %2314 = vst [vmem:[#allocation4 + $0x1c8] sm:$0xff] %v777_v6  ;;  %v1563_v2 = vmul.f32 %v3085_v7, %v888_v59 }
 0x17a   :  { %2316 = vst [vmem:[#allocation4 + $0x1d8] sm:$0xff] %v890_v31  ;;  %v1564_v32 = vmul.f32 %v3093_v11, %v890_v31 }
 0x17b   :  { %v1688_v40 = vadd.f32 %v1687_v0, %v1555_v15  ;;  %v1696_v3 = vadd.f32 %v1562_v29, %v1561_v19  ;;  %v780_v63 = vpop.f32.mrb[80].mxu0  ;;  %v893_v20 = vpop.f32.mrb[80].mxu1 }
 0x17c   :  { %v781_v46 = vadd.f32 %v780_v63, %v3457_v56  ;;  %v782_v34 = vpop.f32.mrb[81].mxu0  ;;  %v894_v1 = vadd.f32 %v893_v20, %v3465_v17  ;;  %v895_v22 = vpop.f32.mrb[81].mxu1 }
 0x17d   :  { %v3570_v52 = vadd.f32 %v1688_v40, %v1556_v33  ;;  %v1697_v36 = vadd.f32 %v1696_v3, %v1563_v2  ;;  %v783_v49 = vadd.f32 %v782_v34, %v3461_v41  ;;  %v784_v14 = vpop.f32.mrb[82].mxu0  ;;  %v896_v30 = vadd.f32 %v895_v22, %v3473_v60  ;;  %v897_v53 = vpop.f32.mrb[82].mxu1 }
 0x17e   :  { %v1569_v57 = vmul.f32 %v3081_v5, %v781_v46  ;;  %2321 = vst [vmem:[#allocation4 + $0x200] sm:$0xff] %v781_v46  ;;  %v785_v13 = vadd.f32 %v784_v14, %v3457_v56  ;;  %2323 = vst [vmem:[#allocation4 + $0x210] sm:$0xff] %v894_v1  ;;  %v786_v12 = vpop.f32.mrb[83].mxu0  ;;  %v898_v35 = vadd.f32 %v897_v53, %v3465_v17  ;;  %v899_v16 = vpop.f32.mrb[83].mxu1 }
 0x17f   :  { %v3577_v43 = vadd.f32 %v1697_v36, %v1564_v32  ;;  %v1570_v26 = vmul.f32 %v3089_v9, %v783_v49  ;;  %2322 = vst [vmem:[#allocation4 + $0x208] sm:$0xff] %v783_v49  ;;  %v1571_v27 = vmul.f32 %v3085_v7, %v894_v1  ;;  %v787_v28 = vadd.f32 %v786_v12, %v3461_v41 }
 0x180   :  { %2324 = vst [vmem:[#allocation4 + $0x218] sm:$0xff] %v896_v30  ;;  %v1577_v23 = vmul.f32 %v3081_v5, %v785_v13  ;;  %2329 = vst [vmem:[#allocation4 + $0x240] sm:$0xff] %v785_v13  ;;  %v900_v10 = vadd.f32 %v899_v16, %v3473_v60  ;;  %v1572_v21 = vmul.f32 %v3093_v11, %v896_v30 }
 0x181   :  { %2331 = vst [vmem:[#allocation4 + $0x250] sm:$0xff] %v898_v35  ;;  %v1705_v18 = vadd.f32 %v1570_v26, %v1569_v57  ;;  %v1578_v4 = vmul.f32 %v3089_v9, %v787_v28  ;;  %2330 = vst [vmem:[#allocation4 + $0x248] sm:$0xff] %v787_v28  ;;  %v1579_v47 = vmul.f32 %v3085_v7, %v898_v35 }
 0x182   :  { %2332 = vst [vmem:[#allocation4 + $0x258] sm:$0xff] %v900_v10  ;;  %v1580_v6 = vmul.f32 %v3093_v11, %v900_v10 }
 0x183   :  { %v1706_v59 = vadd.f32 %v1705_v18, %v1571_v27  ;;  %v1714_v24 = vadd.f32 %v1578_v4, %v1577_v23  ;;  %v790_v62 = vpop.f32.mrb[84].mxu0  ;;  %v903_v15 = vpop.f32.mrb[84].mxu1 }
 0x184   :  { %v791_v19 = vadd.f32 %v790_v62, %v3457_v56  ;;  %v792_v31 = vpop.f32.mrb[85].mxu0  ;;  %v904_v0 = vadd.f32 %v903_v15, %v3465_v17  ;;  %v905_v29 = vpop.f32.mrb[85].mxu1 }
 0x185   :  { %v3590_v33 = vadd.f32 %v1706_v59, %v1572_v21  ;;  %v1715_v2 = vadd.f32 %v1714_v24, %v1579_v47  ;;  %v793_v40 = vadd.f32 %v792_v31, %v3461_v41  ;;  %v794_v3 = vpop.f32.mrb[86].mxu0  ;;  %v906_v63 = vadd.f32 %v905_v29, %v3473_v60  ;;  %v907_v20 = vpop.f32.mrb[86].mxu1 }
 0x186   :  { %v1585_v32 = vmul.f32 %v3081_v5, %v791_v19  ;;  %2337 = vst [vmem:[#allocation4 + $0x280] sm:$0xff] %v791_v19  ;;  %v795_v46 = vadd.f32 %v794_v3, %v3457_v56  ;;  %2339 = vst [vmem:[#allocation4 + $0x290] sm:$0xff] %v904_v0  ;;  %v796_v34 = vpop.f32.mrb[87].mxu0  ;;  %v908_v1 = vadd.f32 %v907_v20, %v3465_v17  ;;  %v909_v22 = vpop.f32.mrb[87].mxu1 }
 0x187   :  { %v3597_v36 = vadd.f32 %v1715_v2, %v1580_v6  ;;  %v1586_v49 = vmul.f32 %v3089_v9, %v793_v40  ;;  %2338 = vst [vmem:[#allocation4 + $0x288] sm:$0xff] %v793_v40  ;;  %v1587_v14 = vmul.f32 %v3085_v7, %v904_v0  ;;  %v797_v30 = vadd.f32 %v796_v34, %v3461_v41 }
 0x188   :  { %2340 = vst [vmem:[#allocation4 + $0x298] sm:$0xff] %v906_v63  ;;  %v1593_v53 = vmul.f32 %v3081_v5, %v795_v46  ;;  %2345 = vst [vmem:[#allocation4 + $0x2c0] sm:$0xff] %v795_v46  ;;  %v910_v57 = vadd.f32 %v909_v22, %v3473_v60  ;;  %v1588_v35 = vmul.f32 %v3093_v11, %v906_v63 }
 0x189   :  { %2347 = vst [vmem:[#allocation4 + $0x2d0] sm:$0xff] %v908_v1  ;;  %v1723_v13 = vadd.f32 %v1586_v49, %v1585_v32  ;;  %v1594_v12 = vmul.f32 %v3089_v9, %v797_v30  ;;  %2346 = vst [vmem:[#allocation4 + $0x2c8] sm:$0xff] %v797_v30  ;;  %v1595_v16 = vmul.f32 %v3085_v7, %v908_v1 }
 0x18a   :  { %2348 = vst [vmem:[#allocation4 + $0x2d8] sm:$0xff] %v910_v57  ;;  %v1596_v10 = vmul.f32 %v3093_v11, %v910_v57 }
 0x18b   :  { %v1724_v26 = vadd.f32 %v1723_v13, %v1587_v14  ;;  %v1732_v27 = vadd.f32 %v1594_v12, %v1593_v53  ;;  %v800_v28 = vpop.f32.mrb[88].mxu0  ;;  %v913_v23 = vpop.f32.mrb[88].mxu1 }
 0x18c   :  { %v801_v18 = vadd.f32 %v800_v28, %v3457_v56  ;;  %v802_v4 = vpop.f32.mrb[89].mxu0  ;;  %v914_v21 = vadd.f32 %v913_v23, %v3465_v17  ;;  %v915_v47 = vpop.f32.mrb[89].mxu1  ;;  %v3632_v28 = vrot.slane %v3449_v51, %v3239_v37 }
 0x18d   :  { %v3610_v59 = vadd.f32 %v1724_v26, %v1588_v35  ;;  %v1733_v24 = vadd.f32 %v1732_v27, %v1595_v16  ;;  %v803_v62 = vadd.f32 %v802_v4, %v3461_v41  ;;  %v804_v15 = vpop.f32.mrb[90].mxu0  ;;  %v916_v6 = vadd.f32 %v915_v47, %v3473_v60  ;;  %v917_v19 = vpop.f32.mrb[90].mxu1 }
 0x18e   :  { %v1601_v31 = vmul.f32 %v3081_v5, %v801_v18  ;;  %2353 = vst [vmem:[#allocation4 + $0x300] sm:$0xff] %v801_v18  ;;  %v805_v0 = vadd.f32 %v804_v15, %v3457_v56  ;;  %2355 = vst [vmem:[#allocation4 + $0x310] sm:$0xff] %v914_v21  ;;  %v806_v29 = vpop.f32.mrb[91].mxu0  ;;  %v918_v2 = vadd.f32 %v917_v19, %v3465_v17  ;;  %v919_v40 = vpop.f32.mrb[91].mxu1 }
 0x18f   :  { %v3617_v3 = vadd.f32 %v1733_v24, %v1596_v10  ;;  %v1602_v63 = vmul.f32 %v3089_v9, %v803_v62  ;;  %2354 = vst [vmem:[#allocation4 + $0x308] sm:$0xff] %v803_v62  ;;  %v1603_v20 = vmul.f32 %v3085_v7, %v914_v21  ;;  %v807_v32 = vadd.f32 %v806_v29, %v3461_v41 }
 0x190   :  { %2356 = vst [vmem:[#allocation4 + $0x318] sm:$0xff] %v916_v6  ;;  %v1609_v46 = vmul.f32 %v3081_v5, %v805_v0  ;;  %2361 = vst [vmem:[#allocation4 + $0x340] sm:$0xff] %v805_v0  ;;  %v920_v34 = vadd.f32 %v919_v40, %v3473_v60  ;;  %v1604_v49 = vmul.f32 %v3093_v11, %v916_v6 }
 0x191   :  { %2363 = vst [vmem:[#allocation4 + $0x350] sm:$0xff] %v918_v2  ;;  %v1741_v1 = vadd.f32 %v1602_v63, %v1601_v31  ;;  %v1610_v22 = vmul.f32 %v3089_v9, %v807_v32  ;;  %2362 = vst [vmem:[#allocation4 + $0x348] sm:$0xff] %v807_v32  ;;  %v1611_v14 = vmul.f32 %v3085_v7, %v918_v2 }
 0x192   :  { %2364 = vst [vmem:[#allocation4 + $0x358] sm:$0xff] %v920_v34  ;;  %v1612_v12 = vmul.f32 %v3093_v11, %v920_v34  ;;  %v3643_v19 = vrot.slane %v3449_v51, %v3242_v39  ;;  %v3654_v39 = vrot.slane %v3449_v51, %v3245_v48  ;;  %v3658_v40 = vrot.slane %v3449_v51, %v3251_v55 }
 0x193   :  { %v1742_v30 = vadd.f32 %v1741_v1, %v1603_v20  ;;  %v1750_v53 = vadd.f32 %v1610_v22, %v1609_v46  ;;  %v810_v57 = vpop.f32.mrb[92].mxu0  ;;  %v923_v13 = vpop.f32.mrb[92].mxu1 }
 0x194   :  { %v811_v35 = vadd.f32 %v810_v57, %v3457_v56  ;;  %v812_v16 = vpop.f32.mrb[93].mxu0  ;;  %v924_v26 = vadd.f32 %v923_v13, %v3465_v17  ;;  %v925_v27 = vpop.f32.mrb[93].mxu1 }
 0x195   :  { %v3634_v23 = vadd.f32 %v1742_v30, %v1604_v49  ;;  %v1751_v10 = vadd.f32 %v1750_v53, %v1611_v14  ;;  %v813_v18 = vadd.f32 %v812_v16, %v3461_v41  ;;  %v814_v4 = vpop.f32.mrb[94].mxu0  ;;  %v926_v21 = vadd.f32 %v925_v27, %v3473_v60  ;;  %v927_v47 = vpop.f32.mrb[94].mxu1 }
 0x196   :  { %v1617_v24 = vmul.f32 %v3081_v5, %v811_v35  ;;  %2369 = vst [vmem:[#allocation4 + $0x380] sm:$0xff] %v811_v35  ;;  %v815_v62 = vadd.f32 %v814_v4, %v3457_v56  ;;  %2371 = vst [vmem:[#allocation4 + $0x390] sm:$0xff] %v924_v26  ;;  %v816_v15 = vpop.f32.mrb[95].mxu0  ;;  %v928_v6 = vadd.f32 %v927_v47, %v3465_v17  ;;  %v929_v37 = vpop.f32.mrb[95].mxu1 }
 0x197   :  { %v3645_v31 = vadd.f32 %v1751_v10, %v1612_v12  ;;  %v1618_v0 = vmul.f32 %v3089_v9, %v813_v18  ;;  %2370 = vst [vmem:[#allocation4 + $0x388] sm:$0xff] %v813_v18  ;;  %v1619_v29 = vmul.f32 %v3085_v7, %v924_v26  ;;  %v817_v2 = vadd.f32 %v816_v15, %v3461_v41 }
 0x198   :  { %2372 = vst [vmem:[#allocation4 + $0x398] sm:$0xff] %v926_v21  ;;  %v1625_v56 = vmul.f32 %v3081_v5, %v815_v62  ;;  %2377 = vst [vmem:[#allocation4 + $0x3c0] sm:$0xff] %v815_v62  ;;  %v930_v17 = vadd.f32 %v929_v37, %v3473_v60  ;;  %v1620_v41 = vmul.f32 %v3093_v11, %v926_v21 }
 0x199   :  { %2379 = vst [vmem:[#allocation4 + $0x3d0] sm:$0xff] %v928_v6  ;;  %v1759_v63 = vadd.f32 %v1618_v0, %v1617_v24  ;;  %v1626_v20 = vmul.f32 %v3089_v9, %v817_v2  ;;  %2378 = vst [vmem:[#allocation4 + $0x3c8] sm:$0xff] %v817_v2  ;;  %v1627_v5 = vmul.f32 %v3085_v7, %v928_v6 }
 0x19a   :  { %2380 = vst [vmem:[#allocation4 + $0x3d8] sm:$0xff] %v930_v17  ;;  %v1628_v48 = vmul.f32 %v3093_v11, %v930_v17 }
 0x19b   :  { %v1760_v32 = vadd.f32 %v1759_v63, %v1619_v29  ;;  %v1768_v46 = vadd.f32 %v1626_v20, %v1625_v56  ;;  %v966_v60 = vpop.f32.mrb[96].mxu0  ;;  %v1079_v34 = vpop.f32.mrb[96].mxu1 }
 0x19c   :  { %v967_v1 = vadd.f32 %v966_v60, %v3632_v28  ;;  %v968_v22 = vpop.f32.mrb[97].mxu0  ;;  %v1080_v55 = vadd.f32 %v1079_v34, %v3654_v39  ;;  %v1081_v51 = vpop.f32.mrb[97].mxu1 }
 0x19d   :  { %v3666_v49 = vadd.f32 %v1760_v32, %v1620_v41  ;;  %v1769_v9 = vadd.f32 %v1768_v46, %v1627_v5  ;;  %v969_v14 = vadd.f32 %v968_v22, %v3643_v19  ;;  %v970_v30 = vpop.f32.mrb[98].mxu0  ;;  %v1082_v7 = vadd.f32 %v1081_v51, %v3658_v40  ;;  %v1083_v53 = vpop.f32.mrb[98].mxu1 }
 0x19e   :  { %v1509_v57 = vmul.f32 %v3308_v42, %v967_v1  ;;  %2261 = vst [vmem:[#allocation4 + $0x20] sm:$0xff] %v967_v1  ;;  %v971_v11 = vadd.f32 %v970_v30, %v3632_v28  ;;  %2263 = vst [vmem:[#allocation4 + $0x30] sm:$0xff] %v1080_v55  ;;  %v972_v13 = vpop.f32.mrb[99].mxu0  ;;  %v1084_v12 = vadd.f32 %v1083_v53, %v3654_v39  ;;  %v1085_v35 = vpop.f32.mrb[99].mxu1 }
 0x19f   :  { %v3673_v16 = vadd.f32 %v1769_v9, %v1628_v48  ;;  %v1510_v26 = vmul.f32 %v3312_v50, %v969_v14  ;;  %2262 = vst [vmem:[#allocation4 + $0x28] sm:$0xff] %v969_v14  ;;  %v973_v27 = vadd.f32 %v972_v13, %v3643_v19  ;;  %2264 = vst [vmem:[#allocation4 + $0x38] sm:$0xff] %v1082_v7 }
 0x1a0   :  { %v1636_v10 = vadd.f32 %v3510_v54, %v1509_v57  ;;  %v1517_v18 = vmul.f32 %v3308_v42, %v971_v11  ;;  %2269 = vst [vmem:[#allocation4 + $0x60] sm:$0xff] %v971_v11  ;;  %v1511_v4 = vmul.f32 %v3319_v44, %v1080_v55  ;;  %2271 = vst [vmem:[#allocation4 + $0x70] sm:$0xff] %v1084_v12 }
 0x1a1   :  { %v1086_v21 = vadd.f32 %v1085_v35, %v3658_v40  ;;  %v1518_v47 = vmul.f32 %v3312_v50, %v973_v27  ;;  %2270 = vst [vmem:[#allocation4 + $0x68] sm:$0xff] %v973_v27  ;;  %v1512_v5 = vmul.f32 %v3338_v45, %v1082_v7  ;;  %v1519_v48 = vmul.f32 %v3319_v44, %v1084_v12 }
 0x1a2   :  { %v1637_v24 = vadd.f32 %v1636_v10, %v1510_v26  ;;  %v1645_v62 = vadd.f32 %v3517_v8, %v1517_v18 }
 0x1a3   :  { %2272 = vst [vmem:[#allocation4 + $0x78] sm:$0xff] %v1086_v21  ;;  %v976_v15 = vpop.f32.mrb[100].mxu0  ;;  %v1089_v6 = vpop.f32.mrb[100].mxu1  ;;  %v1520_v7 = vmul.f32 %v3338_v45, %v1086_v21 }
 0x1a4   :  { %v1646_v37 = vadd.f32 %v1645_v62, %v1518_v47  ;;  %v977_v54 = vadd.f32 %v976_v15, %v3632_v28  ;;  %v978_v0 = vpop.f32.mrb[101].mxu0  ;;  %v1090_v29 = vadd.f32 %v1089_v6, %v3654_v39  ;;  %v1091_v2 = vpop.f32.mrb[101].mxu1  ;;  %v1638_v56 = vadd.f32 %v1637_v24, %v1511_v4 }
 0x1a5   :  { %v979_v17 = vadd.f32 %v978_v0, %v3643_v19  ;;  %v980_v63 = vpop.f32.mrb[102].mxu0  ;;  %v1092_v20 = vadd.f32 %v1091_v2, %v3658_v40  ;;  %v1093_v41 = vpop.f32.mrb[102].mxu1 }
 0x1a6   :  { %v1525_v8 = vmul.f32 %v3308_v42, %v977_v54  ;;  %2277 = vst [vmem:[#allocation4 + $0xa0] sm:$0xff] %v977_v54  ;;  %v981_v32 = vadd.f32 %v980_v63, %v3632_v28  ;;  %2279 = vst [vmem:[#allocation4 + $0xb0] sm:$0xff] %v1090_v29  ;;  %v982_v46 = vpop.f32.mrb[103].mxu0  ;;  %v1094_v60 = vadd.f32 %v1093_v41, %v3654_v39  ;;  %v1095_v34 = vpop.f32.mrb[103].mxu1 }
 0x1a7   :  { %v1526_v1 = vmul.f32 %v3312_v50, %v979_v17  ;;  %2278 = vst [vmem:[#allocation4 + $0xa8] sm:$0xff] %v979_v17  ;;  %v983_v22 = vadd.f32 %v982_v46, %v3643_v19  ;;  %2280 = vst [vmem:[#allocation4 + $0xb8] sm:$0xff] %v1092_v20  ;;  %v1096_v55 = vadd.f32 %v1095_v34, %v3658_v40 }
 0x1a8   :  { %v1654_v51 = vadd.f32 %v3530_v25, %v1525_v8  ;;  %v1533_v9 = vmul.f32 %v3308_v42, %v981_v32  ;;  %2285 = vst [vmem:[#allocation4 + $0xe0] sm:$0xff] %v981_v32  ;;  %v1527_v14 = vmul.f32 %v3319_v44, %v1090_v29  ;;  %2287 = vst [vmem:[#allocation4 + $0xf0] sm:$0xff] %v1094_v60 }
 0x1a9   :  { %v1639_v30 = vadd.f32 %v1638_v56, %v1512_v5  ;;  %v1534_v53 = vmul.f32 %v3312_v50, %v983_v22  ;;  %2286 = vst [vmem:[#allocation4 + $0xe8] sm:$0xff] %v983_v22  ;;  %2288 = vst [vmem:[#allocation4 + $0xf8] sm:$0xff] %v1096_v55  ;;  %v1647_v57 = vadd.f32 %v1646_v37, %v1519_v48 }
 0x1aa   :  { %v1655_v11 = vadd.f32 %v1654_v51, %v1526_v1  ;;  %v1663_v13 = vadd.f32 %v3537_v58, %v1533_v9  ;;  %v1528_v58 = vmul.f32 %v3338_v45, %v1092_v20  ;;  %v1535_v2 = vmul.f32 %v3319_v44, %v1094_v60 }
 0x1ab   :  { %1640 = vadd.xlane.f32.xlu0 %v1639_v30  ;;  %v1648_v12 = vadd.f32 %v1647_v57, %v1520_v7  ;;  %v986_v25 = vpop.f32.mrb[104].mxu0  ;;  %v1099_v35 = vpop.f32.mrb[104].mxu1  ;;  %v1536_v32 = vmul.f32 %v3338_v45, %v1096_v55 }
 0x1ac   :  { %v1664_v26 = vadd.f32 %v1663_v13, %v1534_v53  ;;  %v987_v27 = vadd.f32 %v986_v25, %v3632_v28  ;;  %v988_v10 = vpop.f32.mrb[105].mxu0  ;;  %v1100_v18 = vadd.f32 %v1099_v35, %v3654_v39  ;;  %v1101_v4 = vpop.f32.mrb[105].mxu1  ;;  %v1656_v21 = vadd.f32 %v1655_v11, %v1527_v14 }
 0x1ad   :  { %1649 = vadd.xlane.f32.xlu1 %v1648_v12  ;;  %v989_v47 = vadd.f32 %v988_v10, %v3643_v19  ;;  %v990_v24 = vpop.f32.mrb[106].mxu0  ;;  %v1102_v62 = vadd.f32 %v1101_v4, %v3658_v40  ;;  %v1103_v15 = vpop.f32.mrb[106].mxu1 }
 0x1ae   :  { %v1541_v6 = vmul.f32 %v3308_v42, %v987_v27  ;;  %2293 = vst [vmem:[#allocation4 + $0x120] sm:$0xff] %v987_v27  ;;  %v991_v37 = vadd.f32 %v990_v24, %v3632_v28  ;;  %2295 = vst [vmem:[#allocation4 + $0x130] sm:$0xff] %v1100_v18  ;;  %v992_v54 = vpop.f32.mrb[107].mxu0  ;;  %v1104_v0 = vadd.f32 %v1103_v15, %v3654_v39  ;;  %v1105_v29 = vpop.f32.mrb[107].mxu1 }
 0x1af   :  { %v1542_v56 = vmul.f32 %v3312_v50, %v989_v47  ;;  %2294 = vst [vmem:[#allocation4 + $0x128] sm:$0xff] %v989_v47  ;;  %v993_v17 = vadd.f32 %v992_v54, %v3643_v19  ;;  %2296 = vst [vmem:[#allocation4 + $0x138] sm:$0xff] %v1102_v62  ;;  %v1106_v63 = vadd.f32 %v1105_v29, %v3658_v40 }
 0x1b0   :  { %v1672_v20 = vadd.f32 %v3550_v38, %v1541_v6  ;;  %v1549_v41 = vmul.f32 %v3308_v42, %v991_v37  ;;  %2301 = vst [vmem:[#allocation4 + $0x160] sm:$0xff] %v991_v37  ;;  %v1543_v5 = vmul.f32 %v3319_v44, %v1100_v18  ;;  %2303 = vst [vmem:[#allocation4 + $0x170] sm:$0xff] %v1104_v0 }
 0x1b1   :  { %v1657_v8 = vadd.f32 %v1656_v21, %v1528_v58  ;;  %v1550_v46 = vmul.f32 %v3312_v50, %v993_v17  ;;  %2302 = vst [vmem:[#allocation4 + $0x168] sm:$0xff] %v993_v17  ;;  %2304 = vst [vmem:[#allocation4 + $0x178] sm:$0xff] %v1106_v63  ;;  %v1665_v60 = vadd.f32 %v1664_v26, %v1535_v2 }
 0x1b2   :  { %v1673_v34 = vadd.f32 %v1672_v20, %v1542_v56  ;;  %v1681_v48 = vadd.f32 %v3557_v61, %v1549_v41  ;;  %v1544_v51 = vmul.f32 %v3338_v45, %v1102_v62  ;;  %v1551_v27 = vmul.f32 %v3319_v44, %v1104_v0 }
 0x1b3   :  { %1658 = vadd.xlane.f32.xlu0 %v1657_v8  ;;  %v1666_v1 = vadd.f32 %v1665_v60, %v1536_v32  ;;  %v996_v38 = vpop.f32.mrb[108].mxu0  ;;  %v1552_v6 = vmul.f32 %v3338_v45, %v1106_v63 }
 0x1b4   :  { %v1682_v22 = vadd.f32 %v1681_v48, %v1550_v46  ;;  %v997_v9 = vadd.f32 %v996_v38, %v3632_v28  ;;  %v998_v14 = vpop.f32.mrb[109].mxu0  ;;  %v1109_v30 = vpop.f32.mrb[108].mxu1  ;;  %v1674_v7 = vadd.f32 %v1673_v34, %v1543_v5 }
 0x1b5   :  { %1667 = vadd.xlane.f32.xlu1 %v1666_v1  ;;  %v999_v55 = vadd.f32 %v998_v14, %v3643_v19  ;;  %v1000_v53 = vpop.f32.mrb[110].mxu0  ;;  %v1110_v57 = vadd.f32 %v1109_v30, %v3654_v39  ;;  %v1111_v11 = vpop.f32.mrb[109].mxu1 }
 0x1b6   :  { %v1557_v61 = vmul.f32 %v3308_v42, %v997_v9  ;;  %2309 = vst [vmem:[#allocation4 + $0x1a0] sm:$0xff] %v997_v9  ;;  %v1001_v13 = vadd.f32 %v1000_v53, %v3632_v28  ;;  %v1002_v12 = vpop.f32.mrb[111].mxu0  ;;  %v1112_v25 = vadd.f32 %v1111_v11, %v3658_v40  ;;  %v1113_v35 = vpop.f32.mrb[110].mxu1  ;;  %v1675_v26 = vadd.f32 %v1674_v7, %v1544_v51 }
 0x1b7   :  { %v1558_v10 = vmul.f32 %v3312_v50, %v999_v55  ;;  %2310 = vst [vmem:[#allocation4 + $0x1a8] sm:$0xff] %v999_v55  ;;  %2311 = vst [vmem:[#allocation4 + $0x1b0] sm:$0xff] %v1110_v57  ;;  %v1003_v18 = vadd.f32 %v1002_v12, %v3643_v19  ;;  %v1114_v4 = vadd.f32 %v1113_v35, %v3654_v39  ;;  %v1115_v21 = vpop.f32.mrb[111].mxu1  ;;  %v1336_v15 = vpop.xlane.xlu0 %1335 }
 0x1b8   :  { %v1690_v47 = vadd.f32 %v3570_v52, %v1557_v61  ;;  %v1565_v24 = vmul.f32 %v3308_v42, %v1001_v13  ;;  %2317 = vst [vmem:[#allocation4 + $0x1e0] sm:$0xff] %v1001_v13  ;;  %v1559_v62 = vmul.f32 %v3319_v44, %v1110_v57  ;;  %2312 = vst [vmem:[#allocation4 + $0x1b8] sm:$0xff] %v1112_v25  ;;  %1676 = vadd.xlane.f32.xlu0 %v1675_v26 }
 0x1b9   :  { %v1116_v58 = vadd.f32 %v1115_v21, %v3658_v40  ;;  %v1472_v37 = vmul.f32 0.6, %v1336_v15  ;;  %v1566_v54 = vmul.f32 %v3312_v50, %v1003_v18  ;;  %2318 = vst [vmem:[#allocation4 + $0x1e8] sm:$0xff] %v1003_v18  ;;  %2319 = vst [vmem:[#allocation4 + $0x1f0] sm:$0xff] %v1114_v4  ;;  %v1683_v0 = vadd.f32 %v1682_v22, %v1551_v27 }
 0x1ba   :  { %v1691_v29 = vadd.f32 %v1690_v47, %v1558_v10  ;;  %v1699_v52 = vadd.f32 %v3577_v43, %v1565_v24  ;;  %v1560_v63 = vmul.f32 %v3338_v45, %v1112_v25  ;;  %v1567_v32 = vmul.f32 %v3319_v44, %v1114_v4 }
 0x1bb   :  { %2320 = vst [vmem:[#allocation4 + $0x1f8] sm:$0xff] %v1116_v58  ;;  %1489 = vst.msk [vmem:[%s3970_s6] sm:$0xff] %vm1488_vm2, %v1472_v37  ;;  %v1684_v2 = vadd.f32 %v1683_v0, %v1552_v6  ;;  %v1006_v56 = vpop.f32.mrb[112].mxu0  ;;  %v1345_v20 = vpop.xlane.xlu0 %1344  ;;  %v1568_v43 = vmul.f32 %v3338_v45, %v1116_v58 }
 0x1bc   :  { %v1700_v17 = vadd.f32 %v1699_v52, %v1566_v54  ;;  %v1007_v41 = vadd.f32 %v1006_v56, %v3632_v28  ;;  %v1008_v5 = vpop.f32.mrb[113].mxu0  ;;  %v1692_v8 = vadd.f32 %v1691_v29, %v1559_v62  ;;  %v1473_v46 = vmul.f32 0.6, %v1345_v20 }
 0x1bd   :  { %1685 = vadd.xlane.f32.xlu1 %v1684_v2  ;;  %v1009_v60 = vadd.f32 %v1008_v5, %v3643_v19  ;;  %v1010_v34 = vpop.f32.mrb[114].mxu0  ;;  %v1119_v48 = vpop.f32.mrb[112].mxu1 }
 0x1be   :  { %v1573_v1 = vmul.f32 %v3308_v42, %v1007_v41  ;;  %2325 = vst [vmem:[#allocation4 + $0x220] sm:$0xff] %v1007_v41  ;;  %v1011_v38 = vadd.f32 %v1010_v34, %v3632_v28  ;;  %v1120_v22 = vadd.f32 %v1119_v48, %v3654_v39  ;;  %v1012_v51 = vpop.f32.mrb[115].mxu0  ;;  %v1121_v9 = vpop.f32.mrb[113].mxu1  ;;  %v1693_v14 = vadd.f32 %v1692_v8, %v1560_v63 }
 0x1bf   :  { %1490 = vst.msk [vmem:[%s3970_s6 + $0x8] sm:$0xff] %vm1488_vm2, %v1473_v46  ;;  %v1574_v30 = vmul.f32 %v3312_v50, %v1009_v60  ;;  %2326 = vst [vmem:[#allocation4 + $0x228] sm:$0xff] %v1009_v60  ;;  %v1013_v7 = vadd.f32 %v1012_v51, %v3643_v19  ;;  %v1122_v55 = vadd.f32 %v1121_v9, %v3658_v40  ;;  %v1123_v53 = vpop.f32.mrb[114].mxu1  ;;  %v1354_v12 = vpop.xlane.xlu1 %1353 }
 0x1c0   :  { %v1701_v57 = vadd.f32 %v1700_v17, %v1567_v32  ;;  %v1708_v11 = vadd.f32 %v3590_v33, %v1573_v1  ;;  %v1581_v61 = vmul.f32 %v3308_v42, %v1011_v38  ;;  %2333 = vst [vmem:[#allocation4 + $0x260] sm:$0xff] %v1011_v38  ;;  %v1575_v13 = vmul.f32 %v3319_v44, %v1120_v22  ;;  %v1125_v35 = vpop.f32.mrb[115].mxu1 }
 0x1c1   :  { %2327 = vst [vmem:[#allocation4 + $0x230] sm:$0xff] %v1120_v22  ;;  %v1124_v25 = vadd.f32 %v1123_v53, %v3654_v39  ;;  %1694 = vadd.xlane.f32.xlu0 %v1693_v14  ;;  %v1474_v26 = vmul.f32 0.6, %v1354_v12  ;;  %v1582_v27 = vmul.f32 %v3312_v50, %v1013_v7  ;;  %2334 = vst [vmem:[#allocation4 + $0x268] sm:$0xff] %v1013_v7 }
 0x1c2   :  { %2328 = vst [vmem:[#allocation4 + $0x238] sm:$0xff] %v1122_v55  ;;  %v1126_v10 = vadd.f32 %v1125_v35, %v3658_v40  ;;  %v1709_v18 = vadd.f32 %v1708_v11, %v1574_v30  ;;  %v1717_v33 = vadd.f32 %v3597_v36, %v1581_v61  ;;  %v1702_v4 = vadd.f32 %v1701_v57, %v1568_v43 }
 0x1c3   :  { %2335 = vst [vmem:[#allocation4 + $0x270] sm:$0xff] %v1124_v25  ;;  %1491 = vst.msk [vmem:[%s3970_s6 + $0x10] sm:$0xff] %vm1488_vm2, %v1474_v26  ;;  %v1016_v21 = vpop.f32.mrb[116].mxu0  ;;  %v1576_v24 = vmul.f32 %v3338_v45, %v1122_v55  ;;  %v1363_v62 = vpop.xlane.xlu1 %1362  ;;  %v1583_v36 = vmul.f32 %v3319_v44, %v1124_v25 }
 0x1c4   :  { %2336 = vst [vmem:[#allocation4 + $0x278] sm:$0xff] %v1126_v10  ;;  %v1718_v47 = vadd.f32 %v1717_v33, %v1582_v27  ;;  %1703 = vadd.xlane.f32.xlu1 %v1702_v4  ;;  %v1017_v15 = vadd.f32 %v1016_v21, %v3632_v28  ;;  %v1018_v58 = vpop.f32.mrb[117].mxu0  ;;  %v1710_v6 = vadd.f32 %v1709_v18, %v1575_v13  ;;  %v1475_v54 = vmul.f32 0.6, %v1363_v62 }
 0x1c5   :  { %v1584_v37 = vmul.f32 %v3338_v45, %v1126_v10  ;;  %v1019_v0 = vadd.f32 %v1018_v58, %v3643_v19  ;;  %v1020_v29 = vpop.f32.mrb[118].mxu0  ;;  %v1129_v52 = vpop.f32.mrb[116].mxu1 }
 0x1c6   :  { %v1589_v2 = vmul.f32 %v3308_v42, %v1017_v15  ;;  %2341 = vst [vmem:[#allocation4 + $0x2a0] sm:$0xff] %v1017_v15  ;;  %v1021_v56 = vadd.f32 %v1020_v29, %v3632_v28  ;;  %v1130_v17 = vadd.f32 %v1129_v52, %v3654_v39  ;;  %v1022_v63 = vpop.f32.mrb[119].mxu0  ;;  %v1131_v20 = vpop.f32.mrb[117].mxu1  ;;  %v1711_v41 = vadd.f32 %v1710_v6, %v1576_v24 }
 0x1c7   :  { %1492 = vst.msk [vmem:[%s3970_s6 + $0x18] sm:$0xff] %vm1488_vm2, %v1475_v54  ;;  %v1590_v5 = vmul.f32 %v3312_v50, %v1019_v0  ;;  %2342 = vst [vmem:[#allocation4 + $0x2a8] sm:$0xff] %v1019_v0  ;;  %v1023_v8 = vadd.f32 %v1022_v63, %v3643_v19  ;;  %v1132_v32 = vadd.f32 %v1131_v20, %v3658_v40  ;;  %v1133_v43 = vpop.f32.mrb[118].mxu1  ;;  %v1372_v1 = vpop.xlane.xlu0 %1371 }
 0x1c8   :  { %v1719_v46 = vadd.f32 %v1718_v47, %v1583_v36  ;;  %v1726_v60 = vadd.f32 %v3610_v59, %v1589_v2  ;;  %v1597_v34 = vmul.f32 %v3308_v42, %v1021_v56  ;;  %2349 = vst [vmem:[#allocation4 + $0x2e0] sm:$0xff] %v1021_v56  ;;  %v1591_v48 = vmul.f32 %v3319_v44, %v1130_v17  ;;  %v1135_v22 = vpop.f32.mrb[119].mxu1 }
 0x1c9   :  { %2343 = vst [vmem:[#allocation4 + $0x2b0] sm:$0xff] %v1130_v17  ;;  %v1134_v38 = vadd.f32 %v1133_v43, %v3654_v39  ;;  %1712 = vadd.xlane.f32.xlu0 %v1711_v41  ;;  %v1476_v51 = vmul.f32 0.6, %v1372_v1  ;;  %v1598_v9 = vmul.f32 %v3312_v50, %v1023_v8  ;;  %2350 = vst [vmem:[#allocation4 + $0x2e8] sm:$0xff] %v1023_v8 }
 0x1ca   :  { %2344 = vst [vmem:[#allocation4 + $0x2b8] sm:$0xff] %v1132_v32  ;;  %v1136_v14 = vadd.f32 %v1135_v22, %v3658_v40  ;;  %v1727_v30 = vadd.f32 %v1726_v60, %v1590_v5  ;;  %v1735_v59 = vadd.f32 %v3617_v3, %v1597_v34  ;;  %v1720_v7 = vadd.f32 %v1719_v46, %v1584_v37  ;;  %v1381_v53 = vpop.xlane.xlu1 %1380 }
 0x1cb   :  { %2351 = vst [vmem:[#allocation4 + $0x2f0] sm:$0xff] %v1134_v38  ;;  %1493 = vst.msk [vmem:[%s3970_s6 + $0x20] sm:$0xff] %vm1488_vm2, %v1476_v51  ;;  %v1592_v55 = vmul.f32 %v3338_v45, %v1132_v32  ;;  %v1026_v57 = vpop.f32.mrb[120].mxu0  ;;  %v1477_v61 = vmul.f32 0.6, %v1381_v53  ;;  %v1599_v62 = vmul.f32 %v3319_v44, %v1134_v38 }
 0x1cc   :  { %2352 = vst [vmem:[#allocation4 + $0x2f8] sm:$0xff] %v1136_v14  ;;  %v1736_v11 = vadd.f32 %v1735_v59, %v1598_v9  ;;  %1721 = vadd.xlane.f32.xlu1 %v1720_v7  ;;  %v1027_v13 = vadd.f32 %v1026_v57, %v3632_v28  ;;  %v1028_v12 = vpop.f32.mrb[121].mxu0  ;;  %v1728_v3 = vadd.f32 %v1727_v30, %v1591_v48 }
 0x1cd   :  { %v1139_v25 = vpop.f32.mrb[120].mxu1  ;;  %v1029_v35 = vadd.f32 %v1028_v12, %v3643_v19  ;;  %v1030_v26 = vpop.f32.mrb[122].mxu0  ;;  %1494 = vst.msk [vmem:[%s3970_s6 + $0x28] sm:$0xff] %vm1488_vm2, %v1477_v61  ;;  %v1600_v2 = vmul.f32 %v3338_v45, %v1136_v14 }
 0x1ce   :  { %v1140_v27 = vadd.f32 %v1139_v25, %v3654_v39  ;;  %v1141_v10 = vpop.f32.mrb[121].mxu1  ;;  %v1605_v18 = vmul.f32 %v3308_v42, %v1027_v13  ;;  %2357 = vst [vmem:[#allocation4 + $0x320] sm:$0xff] %v1027_v13  ;;  %v1031_v33 = vadd.f32 %v1030_v26, %v3632_v28  ;;  %v1032_v4 = vpop.f32.mrb[123].mxu0  ;;  %v1729_v24 = vadd.f32 %v1728_v3, %v1592_v55 }
 0x1cf   :  { %v1142_v21 = vadd.f32 %v1141_v10, %v3658_v40  ;;  %v1143_v47 = vpop.f32.mrb[122].mxu1  ;;  %v1606_v15 = vmul.f32 %v3312_v50, %v1029_v35  ;;  %2358 = vst [vmem:[#allocation4 + $0x328] sm:$0xff] %v1029_v35  ;;  %v1033_v58 = vadd.f32 %v1032_v4, %v3643_v19  ;;  %v1390_v29 = vpop.xlane.xlu0 %1389  ;;  %v1737_v63 = vadd.f32 %v1736_v11, %v1599_v62 }
 0x1d0   :  { %2359 = vst [vmem:[#allocation4 + $0x330] sm:$0xff] %v1140_v27  ;;  %v1144_v6 = vadd.f32 %v1143_v47, %v3654_v39  ;;  %v1145_v36 = vpop.f32.mrb[123].mxu1  ;;  %v1744_v37 = vadd.f32 %v3634_v23, %v1605_v18  ;;  %v1613_v54 = vmul.f32 %v3308_v42, %v1031_v33  ;;  %2365 = vst [vmem:[#allocation4 + $0x360] sm:$0xff] %v1031_v33  ;;  %1730 = vadd.xlane.f32.xlu0 %v1729_v24 }
 0x1d1   :  { %v1607_v0 = vmul.f32 %v3319_v44, %v1140_v27  ;;  %2360 = vst [vmem:[#allocation4 + $0x338] sm:$0xff] %v1142_v21  ;;  %v1146_v52 = vadd.f32 %v1145_v36, %v3658_v40  ;;  %v1478_v56 = vmul.f32 0.6, %v1390_v29  ;;  %v1614_v17 = vmul.f32 %v3312_v50, %v1033_v58  ;;  %2366 = vst [vmem:[#allocation4 + $0x368] sm:$0xff] %v1033_v58 }
 0x1d2   :  { %2367 = vst [vmem:[#allocation4 + $0x370] sm:$0xff] %v1144_v6  ;;  %v1745_v20 = vadd.f32 %v1744_v37, %v1606_v15  ;;  %v1753_v23 = vadd.f32 %v3645_v31, %v1613_v54  ;;  %v1608_v41 = vmul.f32 %v3338_v45, %v1142_v21  ;;  %v1399_v5 = vpop.xlane.xlu1 %1398  ;;  %v1738_v8 = vadd.f32 %v1737_v63, %v1600_v2 }
 0x1d3   :  { %2368 = vst [vmem:[#allocation4 + $0x378] sm:$0xff] %v1146_v52  ;;  %1495 = vst.msk [vmem:[%s3970_s6 + $0x30] sm:$0xff] %vm1488_vm2, %v1478_v56  ;;  %v1036_v32 = vpop.f32.mrb[124].mxu0  ;;  %v1479_v46 = vmul.f32 0.6, %v1399_v5  ;;  %v1615_v53 = vmul.f32 %v3319_v44, %v1144_v6  ;;  %v1616_v26 = vmul.f32 %v3338_v45, %v1146_v52 }
 0x1d4   :  { %v1754_v43 = vadd.f32 %v1753_v23, %v1614_v17  ;;  %v1037_v60 = vadd.f32 %v1036_v32, %v3632_v28  ;;  %v1038_v34 = vpop.f32.mrb[125].mxu0  ;;  %v1746_v1 = vadd.f32 %v1745_v20, %v1607_v0  ;;  %1739 = vadd.xlane.f32.xlu1 %v1738_v8 }
 0x1d5   :  { %v1149_v48 = vpop.f32.mrb[124].mxu1  ;;  %v1039_v31 = vadd.f32 %v1038_v34, %v3643_v19  ;;  %v1040_v38 = vpop.f32.mrb[126].mxu0  ;;  %1496 = vst.msk [vmem:[%s3970_s6 + $0x38] sm:$0xff] %vm1488_vm2, %v1479_v46 }
 0x1d6   :  { %v1150_v22 = vadd.f32 %v1149_v48, %v3654_v39  ;;  %v1151_v51 = vpop.f32.mrb[125].mxu1  ;;  %v1621_v9 = vmul.f32 %v3308_v42, %v1037_v60  ;;  %2373 = vst [vmem:[#allocation4 + $0x3a0] sm:$0xff] %v1037_v60  ;;  %v1041_v14 = vadd.f32 %v1040_v38, %v3632_v28  ;;  %v1042_v30 = vpop.f32.mrb[127].mxu0  ;;  %v1747_v55 = vadd.f32 %v1746_v1, %v1608_v41 }
 0x1d7   :  { %v1152_v59 = vadd.f32 %v1151_v51, %v3658_v40  ;;  %v1153_v7 = vpop.f32.mrb[126].mxu1  ;;  %v1622_v57 = vmul.f32 %v3312_v50, %v1039_v31  ;;  %2374 = vst [vmem:[#allocation4 + $0x3a8] sm:$0xff] %v1039_v31  ;;  %v1043_v11 = vadd.f32 %v1042_v30, %v3643_v19  ;;  %v1408_v3 = vpop.xlane.xlu0 %1407 }
 0x1d8   :  { %2375 = vst [vmem:[#allocation4 + $0x3b0] sm:$0xff] %v1150_v22  ;;  %v1154_v61 = vadd.f32 %v1153_v7, %v3654_v39  ;;  %v1155_v13 = vpop.f32.mrb[127].mxu1  ;;  %v1762_v12 = vadd.f32 %v3666_v49, %v1621_v9  ;;  %v1629_v28 = vmul.f32 %v3308_v42, %v1041_v14  ;;  %2381 = vst [vmem:[#allocation4 + $0x3e0] sm:$0xff] %v1041_v14  ;;  %1748 = vadd.xlane.f32.xlu0 %v1747_v55 }
 0x1d9   :  { %v1623_v25 = vmul.f32 %v3319_v44, %v1150_v22  ;;  %2376 = vst [vmem:[#allocation4 + $0x3b8] sm:$0xff] %v1152_v59  ;;  %v1156_v35 = vadd.f32 %v1155_v13, %v3658_v40  ;;  %v1480_v27 = vmul.f32 0.6, %v1408_v3  ;;  %v1630_v19 = vmul.f32 %v3312_v50, %v1043_v11  ;;  %2382 = vst [vmem:[#allocation4 + $0x3e8] sm:$0xff] %v1043_v11 }
 0x1da   :  { %2383 = vst [vmem:[#allocation4 + $0x3f0] sm:$0xff] %v1154_v61  ;;  %v1755_v39 = vadd.f32 %v1754_v43, %v1615_v53  ;;  %v1763_v10 = vadd.f32 %v1762_v12, %v1622_v57  ;;  %v1771_v49 = vadd.f32 %v3673_v16, %v1629_v28  ;;  %v1624_v42 = vmul.f32 %v3338_v45, %v1152_v59  ;;  %v1417_v40 = vpop.xlane.xlu1 %1416 }
 0x1db   :  { %2384 = vst [vmem:[#allocation4 + $0x3f8] sm:$0xff] %v1156_v35  ;;  %1497 = vst.msk [vmem:[%s3970_s6 + $0x40] sm:$0xff] %vm1488_vm2, %v1480_v27  ;;  %v1631_v4 = vmul.f32 %v3319_v44, %v1154_v61  ;;  %v1481_v50 = vmul.f32 0.6, %v1417_v40  ;;  %v1632_v16 = vmul.f32 %v3338_v45, %v1156_v35 }
 0x1dc   :  { %v1756_v18 = vadd.f32 %v1755_v39, %v1616_v26  ;;  %v1772_v33 = vadd.f32 %v1771_v49, %v1630_v19  ;;  %v1764_v21 = vadd.f32 %v1763_v10, %v1623_v25 }
 0x1dd   :  { %1498 = vst.msk [vmem:[%s3970_s6 + $0x48] sm:$0xff] %vm1488_vm2, %v1481_v50 }
 0x1de   :  { %1757 = vadd.xlane.f32.xlu1 %v1756_v18  ;;  %v1765_v47 = vadd.f32 %v1764_v21, %v1624_v42  ;;  %v1773_v24 = vadd.f32 %v1772_v33, %v1631_v4 }
 0x1df   :  { %v1426_v62 = vpop.xlane.xlu0 %1425 }
 0x1e0   :  { %1766 = vadd.xlane.f32.xlu0 %v1765_v47  ;;  %v1774_v15 = vadd.f32 %v1773_v24, %v1632_v16  ;;  %v1482_v58 = vmul.f32 0.6, %v1426_v62 }
 0x1e2   :  { %1775 = vadd.xlane.f32.xlu1 %v1774_v15  ;;  %1499 = vst.msk [vmem:[%s3970_s6 + $0x50] sm:$0xff] %vm1488_vm2, %v1482_v58  ;;  %v1435_v44 = vpop.xlane.xlu1 %1434 }
 0x1e3   :  { %v1483_v6 = vmul.f32 0.6, %v1435_v44 }
 0x1e5   :  { %1500 = vst.msk [vmem:[%s3970_s6 + $0x58] sm:$0xff] %vm1488_vm2, %v1483_v6 }
 0x1e7   :  { %v1444_v45 = vpop.xlane.xlu0 %1443 }
 0x1e8   :  { %v1484_v36 = vmul.f32 0.6, %v1444_v45 }
 0x1ea   :  { %1501 = vst.msk [vmem:[%s3970_s6 + $0x60] sm:$0xff] %vm1488_vm2, %v1484_v36  ;;  %v1453_v37 = vpop.xlane.xlu1 %1452 }
 0x1eb   :  { %v1485_v54 = vmul.f32 0.6, %v1453_v37 }
 0x1ed   :  { %1502 = vst.msk [vmem:[%s3970_s6 + $0x68] sm:$0xff] %vm1488_vm2, %v1485_v54 }
 0x1ef   :  { %v1462_v0 = vpop.xlane.xlu0 %1461 }
 0x1f0   :  { %v1486_v29 = vmul.f32 0.6, %v1462_v0 }
 0x1f2   :  { %v1471_v52 = vpop.xlane.xlu1 %1470  ;;  %1503 = vst.msk [vmem:[%s3970_s6 + $0x70] sm:$0xff] %vm1488_vm2, %v1486_v29 }
 0x1f3   :  { %v1487_v2 = vmul.f32 0.6, %v1471_v52 }
 0x1f5   :  { %1504 = vst.msk [vmem:[%s3970_s6 + $0x78] sm:$0xff] %vm1488_vm2, %v1487_v2 }
 0x1f6   :  { %2675 = shalt.err (!%p2672_p4)
}
 0x1f7   :  { %s2676_s15 = scalar_lea.hbm %s3968_s4, 8192 }
 0x1f8   :  { %p2677_p5 = scmp.ne.s32.totalorder %s3968_s4, %s2676_s15  ;;  %p2680_p6 = scmp.lt.u32.totalorder %s2676_s15, %s3968_s4 }
 0x1fa   :  { %p2682_p7 = pnand %p2680_p6, %p2677_p5 }
 0x1fc   :  { %2685 = shalt.err (!%p2682_p7)
}
 0x1fd   :  { %s2714_s6 = smov 512   ;;  %s2715_s20 = smov 32  }
 0x1fe   :  { %2396 = dma.vmem_to_hbm [thread:$0]  %s2391_s9, 8192, %s3968_s4, [#allocation3], %s2714_s6, %s2714_s6, %s2715_s20  }
 0x1ff   :  { %s2716_s22 = smov [#allocation4]  }
 0x200   :  { %s2402_s23 = sshll.u32 %s2716_s22, 4  ;;  %s2403_s23 = int_to_ptr.vmem [resolvable:$true] %s2402_s23 }
 0x201   :  { %s2686_s24 = scalar_lea.vmem %s2403_s23, 16384  ;;  %p2691_p9 = scmp.lt.s32.totalorder %s2403_s23, %s2403_s23 }
 0x202   :  { %p2687_p8 = scmp.ne.s32.totalorder %s2403_s23, %s2686_s24  ;;  %p2692_p10 = scmp.lt.s32.totalorder %s2686_s24, %s2686_s24 }
 0x204   :  { %p2693_p11 = por %p2692_p10, %p2691_p9 }
 0x206   :  { %p2694_p12 = pnand %p2693_p11, %p2687_p8 }
 0x208   :  { %2697 = shalt.err (!%p2694_p12)
}
 0x209   :  { %s2698_s26 = scalar_lea.hbm %s3969_s5, 16384 }
 0x20a   :  { %p2699_p13 = scmp.ne.s32.totalorder %s3969_s5, %s2698_s26  ;;  %p2702_p0 = scmp.lt.u32.totalorder %s2698_s26, %s3969_s5 }
 0x20c   :  { %p2704_p1 = pnand %p2702_p0, %p2699_p13 }
 0x20e   :  { %2707 = shalt.err (!%p2704_p1)
}
 0x20f   :  { %s2717_s2 = smov 1024   ;;  %s2718_s29 = smov 64  }
 0x210   :  { %2408 = dma.vmem_to_hbm [thread:$0]  %s2403_s23, 16384, %s3969_s5, [#allocation5], %s2717_s2, %s2717_s2, %s2718_s29  }
 0x238   :  { %v1641_v56 = vpop.xlane.xlu0 %1640 }
 0x239   :  { %v1777_v17 = vmul.f32 0.6, %v1641_v56 }
 0x23a   :  { %v1650_v63 = vpop.xlane.xlu1 %1649 }
 0x23b   :  { %1793 = vst.msk [vmem:[%s3971_s7] sm:$0xff] %vm1488_vm2, %v1777_v17  ;;  %v1778_v20 = vmul.f32 0.6, %v1650_v63 }
 0x23d   :  { %1794 = vst.msk [vmem:[%s3971_s7 + $0x8] sm:$0xff] %vm1488_vm2, %v1778_v20 }
 0x240   :  { %v1659_v23 = vpop.xlane.xlu0 %1658 }
 0x241   :  { %v1779_v41 = vmul.f32 0.6, %v1659_v23 }
 0x242   :  { %v1668_v5 = vpop.xlane.xlu1 %1667 }
 0x243   :  { %1795 = vst.msk [vmem:[%s3971_s7 + $0x10] sm:$0xff] %vm1488_vm2, %v1779_v41  ;;  %v1780_v8 = vmul.f32 0.6, %v1668_v5 }
 0x245   :  { %1796 = vst.msk [vmem:[%s3971_s7 + $0x18] sm:$0xff] %vm1488_vm2, %v1780_v8  ;;  %v1677_v32 = vpop.xlane.xlu0 %1676 }
 0x246   :  { %v1781_v43 = vmul.f32 0.6, %v1677_v32 }
 0x248   :  { %1797 = vst.msk [vmem:[%s3971_s7 + $0x20] sm:$0xff] %vm1488_vm2, %v1781_v43 }
 0x24a   :  { %v1686_v46 = vpop.xlane.xlu1 %1685 }
 0x24b   :  { %v1782_v60 = vmul.f32 0.6, %v1686_v46 }
 0x24d   :  { %1798 = vst.msk [vmem:[%s3971_s7 + $0x28] sm:$0xff] %vm1488_vm2, %v1782_v60 }
 0x24e   :  { %v1695_v34 = vpop.xlane.xlu0 %1694 }
 0x24f   :  { %v1783_v48 = vmul.f32 0.6, %v1695_v34 }
 0x251   :  { %1799 = vst.msk [vmem:[%s3971_s7 + $0x30] sm:$0xff] %vm1488_vm2, %v1783_v48  ;;  %v1704_v1 = vpop.xlane.xlu1 %1703 }
 0x252   :  { %v1784_v31 = vmul.f32 0.6, %v1704_v1 }
 0x254   :  { %1800 = vst.msk [vmem:[%s3971_s7 + $0x38] sm:$0xff] %vm1488_vm2, %v1784_v31 }
 0x256   :  { %v1713_v38 = vpop.xlane.xlu0 %1712 }
 0x257   :  { %v1785_v22 = vmul.f32 0.6, %v1713_v38 }
 0x259   :  { %1801 = vst.msk [vmem:[%s3971_s7 + $0x40] sm:$0xff] %vm1488_vm2, %v1785_v22  ;;  %v1722_v51 = vpop.xlane.xlu1 %1721 }
 0x25a   :  { %v1786_v9 = vmul.f32 0.6, %v1722_v51 }
 0x25c   :  { %1802 = vst.msk [vmem:[%s3971_s7 + $0x48] sm:$0xff] %vm1488_vm2, %v1786_v9 }
 0x25d   :  { %v1731_v14 = vpop.xlane.xlu0 %1730 }
 0x25e   :  { %v1787_v30 = vmul.f32 0.6, %v1731_v14 }
 0x260   :  { %1803 = vst.msk [vmem:[%s3971_s7 + $0x50] sm:$0xff] %vm1488_vm2, %v1787_v30 }
 0x261   :  { %v1740_v59 = vpop.xlane.xlu1 %1739 }
 0x262   :  { %v1788_v7 = vmul.f32 0.6, %v1740_v59 }
 0x264   :  { %1804 = vst.msk [vmem:[%s3971_s7 + $0x58] sm:$0xff] %vm1488_vm2, %v1788_v7 }
 0x265   :  { %v1749_v55 = vpop.xlane.xlu0 %1748 }
 0x266   :  { %v1789_v53 = vmul.f32 0.6, %v1749_v55 }
 0x268   :  { %1805 = vst.msk [vmem:[%s3971_s7 + $0x60] sm:$0xff] %vm1488_vm2, %v1789_v53 }
 0x26b   :  { %v1758_v57 = vpop.xlane.xlu1 %1757 }
 0x26c   :  { %v1790_v11 = vmul.f32 0.6, %v1758_v57 }
 0x26d   :  { %v1767_v61 = vpop.xlane.xlu0 %1766 }
 0x26e   :  { %1806 = vst.msk [vmem:[%s3971_s7 + $0x68] sm:$0xff] %vm1488_vm2, %v1790_v11  ;;  %v1791_v13 = vmul.f32 0.6, %v1767_v61 }
 0x26f   :  { %v1776_v12 = vpop.xlane.xlu1 %1775 }
 0x270   :  { %1807 = vst.msk [vmem:[%s3971_s7 + $0x70] sm:$0xff] %vm1488_vm2, %v1791_v13  ;;  %v1792_v28 = vmul.f32 0.6, %v1776_v12 }
 0x272   :  { %1808 = vst.msk [vmem:[%s3971_s7 + $0x78] sm:$0xff] %vm1488_vm2, %v1792_v28 }
 0x273   :  { %2708 = dma.done.wait [#allocation3], 8192  }
 0x274   :  { %2709 = vsyncadd [#allocation3], 4294959104 }
 0x275   :  { %2710 = dma.done.wait [#allocation5], 16384  }
 0x276   :  { %2711 = vsyncadd [#allocation5], 4294950912 }
 0x277   :  { %2423 = vsyncpa [#allocation3], 1 }
 0x278   :  { %2424 = vsyncpa [#allocation5], 1 }

</bundles_post_ra>
